<compile_context>
chip_gen: v7x
topology: tpu7x:2x2x1
jax: 0.10.0
libtpu: 0.0.40
codegen_flags: <defaults>
</compile_context>

<pallas_src>
import jax
import jax.numpy as jnp
from jax.experimental import pallas as pl
from jax.experimental.pallas import tpu as pltpu

H1_PAD = 512      # 400 padded to a multiple of 128
H2_PAD = 384      # 300 padded to a multiple of 128


def _round_up(x, m):
    return (x + m - 1) // m * m


def critic_kernel(x_ref, u_ref, w1_ref, b1_ref, w2t_ref, b2_ref,
                  w3_ref, b3_ref, out_ref):
    # ---- Layer 1: one MXU matmul on the in-VMEM concat of [x | u] ----------
    xu = jnp.concatenate(
        [x_ref[...].astype(jnp.bfloat16), u_ref[...].astype(jnp.bfloat16)],
        axis=1)                                                   # (TM, S+A) bf16
    h1 = jnp.dot(xu, w1_ref[...], preferred_element_type=jnp.float32)
    h1 = jnp.maximum(h1 + b1_ref[...], 0.0)                       # (TM, 512) f32

    # ---- Layer 2 (transposed, NT matmul: contract last dims) ---------------
    #   h2_T[j, t] = sum_h W2[h, j] * h1[t, h]   -> (384, TM)
    # Batch ends up on lanes so the N=1 head below is lane-dense for free.
    h2t = jax.lax.dot_general(
        w2t_ref[...], h1.astype(jnp.bfloat16),
        dimension_numbers=(((1,), (1,)), ((), ())),
        preferred_element_type=jnp.float32)                       # (384, TM) f32
    h2t = jnp.maximum(h2t + b2_ref[...], 0.0)

    # ---- Layer 3 head (300 -> 1) on VPU/XLU, MXU stays free -----------------
    # w3_ref is (384, 128) with w3 replicated across lanes; reduce over
    # sublanes 128 batch rows (= lanes) at a time.  Result is packed
    # lane-dense: out[g, l] = q[row g*128 + l]  (4 B/row HBM writeback).
    n_rows = out_ref.shape[0]                                     # tm // 128
    chunks = []
    for g in range(n_rows):
        blk = h2t[:, g * 128:(g + 1) * 128] * w3_ref[...]         # (384, 128)
        chunks.append(jnp.sum(blk, axis=0, keepdims=True))        # (1, 128)
    out_ref[...] = jnp.concatenate(chunks, axis=0) + b3_ref[...]  # (tm//128, 128)


def critic_forward(x, u, kernel_params, *, tile_m=1024):
    """x: (B, state_dim), u: (B, action_dim) (f32 or bf16) -> (B, 1) f32."""
    w1, b1, w2t, b2, w3b, b3 = kernel_params
    B, state_dim = x.shape
    action_dim = u.shape[1]
    d_in = state_dim + action_dim

    # Batch tiling: single tile (round_up to 128) for small batches, otherwise
    # tiles that are multiples of 1024 rows so the packed output block
    # (tm//128, 128) keeps its second-minor dim a multiple of 8.
    if B <= 1024:
        tm = _round_up(B, 128)
        num_tiles = 1
    else:
        tm = max(1024, _round_up(tile_m, 1024))
        num_tiles = pl.cdiv(B, tm)
    b_pad = tm * num_tiles
    if b_pad != B:
        x = jnp.pad(x, ((0, b_pad - B), (0, 0)))
        u = jnp.pad(u, ((0, b_pad - B), (0, 0)))

    flops = 2 * b_pad * (d_in * H1_PAD + H1_PAD * H2_PAD + H2_PAD)
    bytes_accessed = (x.size * x.dtype.itemsize + u.size * u.dtype.itemsize
                      + (w1.size + w2t.size) * 2
                      + (b1.size + b2.size + w3b.size + b3.size) * 4
                      + b_pad * 4)

    out = pl.pallas_call(
        critic_kernel,
        out_shape=jax.ShapeDtypeStruct((b_pad // 128, 128), jnp.float32),
        grid=(num_tiles,),
        in_specs=[
            pl.BlockSpec((tm, state_dim), lambda i: (i, 0)),       # x tile
            pl.BlockSpec((tm, action_dim), lambda i: (i, 0)),      # u tile
            pl.BlockSpec((d_in, H1_PAD), lambda i: (0, 0)),        # W1 (resident, bf16)
            pl.BlockSpec((1, H1_PAD), lambda i: (0, 0)),           # b1
            pl.BlockSpec((H2_PAD, H1_PAD), lambda i: (0, 0)),      # W2^T (resident, bf16)
            pl.BlockSpec((H2_PAD, 1), lambda i: (0, 0)),           # b2 column
            pl.BlockSpec((H2_PAD, 128), lambda i: (0, 0)),         # w3 lane-replicated
            pl.BlockSpec((1, 128), lambda i: (0, 0)),              # b3 lane-replicated
        ],
        out_specs=pl.BlockSpec((tm // 128, 128), lambda i: (i, 0)),
        compiler_params=pltpu.CompilerParams(
            dimension_semantics=("parallel",),
            vmem_limit_bytes=32 * 1024 * 1024),
        cost_estimate=pl.CostEstimate(flops=flops, transcendentals=0,
                                      bytes_accessed=bytes_accessed),
    )(x, u, w1, b1, w2t, b2, w3b, b3)

    return out.reshape(b_pad, 1)[:B]


def init_critic_params(key, state_dim, action_dim):
    """f32 params mimicking PyTorch nn.Linear default init (pre-transposed)."""
    d_in = state_dim + action_dim
    dims = [(d_in, 400), (400, 300), (300, 1)]
    params = []
    for i, (fi, fo) in enumerate(dims):
        kw, kb = jax.random.split(jax.random.fold_in(key, i))
        bound = 1.0 / jnp.sqrt(jnp.float32(fi))
        w = jax.random.uniform(kw, (fi, fo), jnp.float32, -bound, bound)
        b = jax.random.uniform(kb, (1, fo), jnp.float32, -bound, bound)
        params += [w, b]
    return tuple(params)


def pack_critic_params(params, state_dim, action_dim):
    """Pad / transpose / bf16-cast the f32 params into the kernel layout."""
    w1, b1, w2, b2, w3, b3 = params
    h1, h2 = w1.shape[1], w2.shape[1]
    # W1: (d_in, 400) -> (d_in, 512) bf16, kept whole (kernel concats x|u).
    w1p = jnp.pad(w1, ((0, 0), (0, H1_PAD - h1))).astype(jnp.bfloat16)
    b1p = jnp.pad(b1, ((0, 0), (0, H1_PAD - h1)))                       # (1, 512) f32
    # W2: (400, 300) -> W2^T padded to (384, 512) bf16 for the NT matmul.
    w2t = jnp.pad(w2.T, ((0, H2_PAD - h2), (0, H1_PAD - h1))).astype(jnp.bfloat16)
    b2c = jnp.pad(b2.T, ((0, H2_PAD - h2), (0, 0)))                     # (384, 1) f32
    # W3: (300, 1) -> (384, 1) zero-padded, replicated across 128 lanes (f32 head).
    w3c = jnp.pad(w3, ((0, H2_PAD - h2), (0, 0)))
    w3b = jnp.asarray(jnp.broadcast_to(w3c, (H2_PAD, 128)), jnp.float32)
    b3r = jnp.full((1, 128), b3[0, 0], jnp.float32)
    return (w1p, b1p, w2t, b2c, w3b, b3r)


def critic_reference(x, u, params):
    """Pure-JAX reference with the same bf16-on-MXU / f32-accumulate numerics."""
    w1, b1, w2, b2, w3, b3 = params
    bf = jnp.bfloat16
    xu = jnp.concatenate([x, u], axis=1)
    h = jnp.maximum(jnp.dot(xu.astype(bf), w1.astype(bf),
                            preferred_element_type=jnp.float32) + b1, 0.0)
    h = jnp.maximum(jnp.dot(h.astype(bf), w2.astype(bf),
                            preferred_element_type=jnp.float32) + b2, 0.0)
    return jnp.dot(h, w3) + b3


if __name__ == "__main__":
    key = jax.random.PRNGKey(0)
    k_params, k_x, k_u = jax.random.split(key, 3)

    batch, state_dim, action_dim = 2, 16, 4
    params = init_critic_params(k_params, state_dim, action_dim)
    kernel_params = pack_critic_params(params, state_dim, action_dim)

    x = jax.random.normal(k_x, (batch, state_dim), jnp.float32)
    u = jax.random.normal(k_u, (batch, action_dim), jnp.float32)

    out = jax.block_until_ready(critic_forward(x, u, kernel_params))
    ref = critic_reference(x, u, params)

    assert out.shape == (batch, 1), out.shape
    assert jnp.allclose(out, ref, atol=1e-2, rtol=1e-2), (out, ref)

    print("KERNEL_OK")
</pallas_src>

<mosaic_0001>
module attributes {stable_mosaic.version = 11 : i64} {
  func.func @critic_kernel(%arg0: i32, %arg1: memref<128x16xf32, #tpu.memory_space<vmem>>, %arg2: memref<128x4xf32, #tpu.memory_space<vmem>>, %arg3: memref<20x512xbf16, #tpu.memory_space<vmem>>, %arg4: memref<1x512xf32, #tpu.memory_space<vmem>>, %arg5: memref<384x512xbf16, #tpu.memory_space<vmem>>, %arg6: memref<384x1xf32, #tpu.memory_space<vmem>>, %arg7: memref<384x128xf32, #tpu.memory_space<vmem>>, %arg8: memref<1x128xf32, #tpu.memory_space<vmem>>, %arg9: memref<1x128xf32, #tpu.memory_space<vmem>>) attributes {dimension_semantics = [#tpu.dimension_semantics<parallel>], iteration_bounds = array<i64: 1>, scalar_prefetch = 0 : i64, scratch_operands = 0 : i64, tpu.core_type = #tpu.core_type<tc>, window_params = [{transform_indices = @transform_0, window_bounds = array<i64: 128, 16>}, {transform_indices = @transform_1, window_bounds = array<i64: 128, 4>}, {pipeline_mode = #tpu.pipeline_mode<synchronous>, transform_indices = @transform_2, window_bounds = array<i64: 20, 512>}, {pipeline_mode = #tpu.pipeline_mode<synchronous>, transform_indices = @transform_3, window_bounds = array<i64: 1, 512>}, {pipeline_mode = #tpu.pipeline_mode<synchronous>, transform_indices = @transform_4, window_bounds = array<i64: 384, 512>}, {pipeline_mode = #tpu.pipeline_mode<synchronous>, transform_indices = @transform_5, window_bounds = array<i64: 384, 1>}, {pipeline_mode = #tpu.pipeline_mode<synchronous>, transform_indices = @transform_6, window_bounds = array<i64: 384, 128>}, {pipeline_mode = #tpu.pipeline_mode<synchronous>, transform_indices = @transform_7, window_bounds = array<i64: 1, 128>}, {transform_indices = @transform_8, window_bounds = array<i64: 1, 128>}]} {
    %c0 = arith.constant 0 : index
    %c0_0 = arith.constant 0 : index
    %0 = vector.load %arg1[%c0, %c0_0] : memref<128x16xf32, #tpu.memory_space<vmem>>, vector<128x16xf32>
    %1 = arith.truncf %0 : vector<128x16xf32> to vector<128x16xbf16>
    %c0_1 = arith.constant 0 : index
    %c0_2 = arith.constant 0 : index
    %2 = vector.load %arg2[%c0_1, %c0_2] : memref<128x4xf32, #tpu.memory_space<vmem>>, vector<128x4xf32>
    %3 = arith.truncf %2 : vector<128x4xf32> to vector<128x4xbf16>
    %4 = tpu.concatenate %1, %3 in 1 : vector<128x16xbf16>, vector<128x4xbf16> -> vector<128x20xbf16>
    %c0_3 = arith.constant 0 : index
    %c0_4 = arith.constant 0 : index
    %5 = vector.load %arg3[%c0_3, %c0_4] : memref<20x512xbf16, #tpu.memory_space<vmem>>, vector<20x512xbf16>
    %cst = arith.constant dense<0.000000e+00> : vector<128x512xf32>
    %6 = tpu.matmul %4, %5, %cst {dimension_numbers = #tpu.dot_dimension_numbers<[1], [0], [0], [1], [0, 0, 1, 1], [], []>} : vector<128x20xbf16>, vector<20x512xbf16>, vector<128x512xf32> -> vector<128x512xf32>
    %c0_5 = arith.constant 0 : index
    %c0_6 = arith.constant 0 : index
    %7 = vector.load %arg4[%c0_5, %c0_6] : memref<1x512xf32, #tpu.memory_space<vmem>>, vector<1x512xf32>
    %8 = vector.broadcast %7 : vector<1x512xf32> to vector<128x512xf32>
    %9 = arith.addf %6, %8 : vector<128x512xf32>
    %cst_7 = arith.constant 0.000000e+00 : f32
    %10 = vector.broadcast %cst_7 : f32 to vector<128x512xf32>
    %11 = arith.maximumf %9, %10 : vector<128x512xf32>
    %c0_8 = arith.constant 0 : index
    %c0_9 = arith.constant 0 : index
    %12 = vector.load %arg5[%c0_8, %c0_9] : memref<384x512xbf16, #tpu.memory_space<vmem>>, vector<384x512xbf16>
    %13 = arith.truncf %11 : vector<128x512xf32> to vector<128x512xbf16>
    %cst_10 = arith.constant dense<0.000000e+00> : vector<384x128xf32>
    %14 = tpu.matmul %12, %13, %cst_10 {dimension_numbers = #tpu.dot_dimension_numbers<[1], [1], [0], [0], [0, 0, 1, 0], [], []>} : vector<384x512xbf16>, vector<128x512xbf16>, vector<384x128xf32> -> vector<384x128xf32>
    %c0_11 = arith.constant 0 : index
    %c0_12 = arith.constant 0 : index
    %15 = vector.load %arg6[%c0_11, %c0_12] : memref<384x1xf32, #tpu.memory_space<vmem>>, vector<384x1xf32>
    %16 = vector.broadcast %15 : vector<384x1xf32> to vector<384x128xf32>
    %17 = arith.addf %14, %16 : vector<384x128xf32>
    %cst_13 = arith.constant 0.000000e+00 : f32
    %18 = vector.broadcast %cst_13 : f32 to vector<384x128xf32>
    %19 = arith.maximumf %17, %18 : vector<384x128xf32>
    %c0_14 = arith.constant 0 : index
    %c0_15 = arith.constant 0 : index
    %20 = vector.load %arg7[%c0_14, %c0_15] : memref<384x128xf32, #tpu.memory_space<vmem>>, vector<384x128xf32>
    %21 = arith.mulf %19, %20 : vector<384x128xf32>
    %cst_16 = arith.constant dense<0.000000e+00> : vector<128xf32>
    %22 = vector.multi_reduction <add>, %21, %cst_16 [0] : vector<384x128xf32> to vector<128xf32>
    %23 = vector.shape_cast %22 : vector<128xf32> to vector<1x128xf32>
    %c0_17 = arith.constant 0 : index
    %c0_18 = arith.constant 0 : index
    %24 = vector.load %arg8[%c0_17, %c0_18] : memref<1x128xf32, #tpu.memory_space<vmem>>, vector<1x128xf32>
    %25 = arith.addf %23, %24 : vector<1x128xf32>
    %c0_19 = arith.constant 0 : index
    %c0_20 = arith.constant 0 : index
    %26 = vector.load %arg9[%c0_19, %c0_20] : memref<1x128xf32, #tpu.memory_space<vmem>>, vector<1x128xf32>
    tpu.vector_store %arg9[%c0_19, %c0_20], %25 {strides = array<i32>} : memref<1x128xf32, #tpu.memory_space<vmem>>, vector<1x128xf32>,
    return
  }
  func.func @transform_0(%arg0: i32) -> (i32, i32) {
    %c0_i32 = arith.constant 0 : i32
    %c0_i32_0 = arith.constant 0 : i32
    return %arg0, %c0_i32 : i32, i32
  }
  func.func @transform_1(%arg0: i32) -> (i32, i32) {
    %c0_i32 = arith.constant 0 : i32
    %c0_i32_0 = arith.constant 0 : i32
    return %arg0, %c0_i32 : i32, i32
  }
  func.func @transform_2(%arg0: i32) -> (i32, i32) {
    %c0_i32 = arith.constant 0 : i32
    %c0_i32_0 = arith.constant 0 : i32
    %c0_i32_1 = arith.constant 0 : i32
    return %c0_i32, %c0_i32_0 : i32, i32
  }
  func.func @transform_3(%arg0: i32) -> (i32, i32) {
    %c0_i32 = arith.constant 0 : i32
    %c0_i32_0 = arith.constant 0 : i32
    %c0_i32_1 = arith.constant 0 : i32
    return %c0_i32, %c0_i32_0 : i32, i32
  }
  func.func @transform_4(%arg0: i32) -> (i32, i32) {
    %c0_i32 = arith.constant 0 : i32
    %c0_i32_0 = arith.constant 0 : i32
    %c0_i32_1 = arith.constant 0 : i32
    return %c0_i32, %c0_i32_0 : i32, i32
  }
  func.func @transform_5(%arg0: i32) -> (i32, i32) {
    %c0_i32 = arith.constant 0 : i32
    %c0_i32_0 = arith.constant 0 : i32
    %c0_i32_1 = arith.constant 0 : i32
    return %c0_i32, %c0_i32_0 : i32, i32
  }
  func.func @transform_6(%arg0: i32) -> (i32, i32) {
    %c0_i32 = arith.constant 0 : i32
    %c0_i32_0 = arith.constant 0 : i32
    %c0_i32_1 = arith.constant 0 : i32
    return %c0_i32, %c0_i32_0 : i32, i32
  }
  func.func @transform_7(%arg0: i32) -> (i32, i32) {
    %c0_i32 = arith.constant 0 : i32
    %c0_i32_0 = arith.constant 0 : i32
    %c0_i32_1 = arith.constant 0 : i32
    return %c0_i32, %c0_i32_0 : i32, i32
  }
  func.func @transform_8(%arg0: i32) -> (i32, i32) {
    %c0_i32 = arith.constant 0 : i32
    %c0_i32_0 = arith.constant 0 : i32
    return %arg0, %c0_i32 : i32, i32
  }
}

</mosaic_0001>

<bundles_post_ra>
// kernel: tpu_custom_call.1
= control target key start
LH: loop header
LB: loop body
LE: loop exit
PB: predicated region body
PF: predicated region fallthrough
CT: control target
= control target key end

     0   :  { %13 = vsyncpa [#allocation3], 0  ;;  %s3117_s0 = inlined_call_operand.vmem [shape: f32[128,16], index: 0, kind: input, shape index: {}]   ;;  %s3118_s1 = inlined_call_operand.vmem [shape: f32[128,4], index: 1, kind: input, shape index: {}]   ;;  %s3119_s2 = inlined_call_operand.vmem [shape: bf16[20,512], index: 2, kind: input, shape index: {}]   ;;  %s3120_s3 = inlined_call_operand.vmem [shape: f32[1,512], index: 3, kind: input, shape index: {}]   ;;  %s3121_s4 = inlined_call_operand.hbm [shape: bf16[384,512], index: 4, kind: input, shape index: {}]   ;;  %s3122_s5 = inlined_call_operand.vmem [shape: f32[384,1], index: 5, kind: input, shape index: {}]   ;;  %s3123_s6 = inlined_call_operand.vmem [shape: f32[384,128], index: 6, kind: input, shape index: {}]   ;;  %s3124_s7 = inlined_call_operand.vmem [shape: f32[1,128], index: 7, kind: input, shape index: {}]   ;;  %s3125_s8 = inlined_call_operand.hbm [shape: f32[1,128], index: 8, kind: output, shape index: {}]  }
   0x1   :  { %14 = vsyncpa [#allocation4], 0  ;;  %s2508_s27 = smov [#allocation2]   ;;  %s2460_s9 = scalar_lea.hbm %s3121_s4, 12288 }
   0x2   :  { %s28_s28 = sshll.u32 %s2508_s27, 4  ;;  %p2461_p0 = scmp.ne.s32.totalorder %s3121_s4, %s2460_s9  ;;  %s29_s28 = int_to_ptr.vmem [resolvable:$true] %s28_s28 }
   0x3   :  { %p2464_p1 = scmp.lt.u32.totalorder %s2460_s9, %s3121_s4 }
   0x5   :  { %p2466_p2 = pnand %p2464_p1, %p2461_p0 }
   0x7   :  { %2469 = shalt.err (!%p2466_p2)
}
   0x8   :  { %s2470_s14 = scalar_lea.vmem %s29_s28, 12288  ;;  %p2475_p4 = scmp.lt.s32.totalorder %s29_s28, %s29_s28 }
   0x9   :  { %p2471_p3 = scmp.ne.s32.totalorder %s29_s28, %s2470_s14  ;;  %p2476_p5 = scmp.lt.s32.totalorder %s2470_s14, %s2470_s14 }
   0xb   :  { %p2477_p6 = por %p2476_p5, %p2475_p4 }
   0xd   :  { %p2478_p7 = pnand %p2477_p6, %p2471_p3 }
   0xf   :  { %2481 = shalt.err (!%p2478_p7)
}
  0x10   :  { %s2509_s15 = smov 256   ;;  %s2510_s16 = smov 16  }
  0x11   :  { %34 = dma.hbm_to_vmem [thread:$0]  %s3121_s4, 12288, %s29_s28, [#allocation3], %s2509_s15, %s2509_s15, %s2510_s16  }
  0x12   :  { %2504 = dma.done.wait [#allocation3], 12288  }
  0x13   :  { %2505 = vsyncadd [#allocation3], 4294955008  ;;  %v2511_v0 = vmov 0   ;;  %v69_v1 = vld [vmem:[%s3118_s1] sm:$0xff]  ;;  %v70_v2 = vld [vmem:[%s3118_s1 + $0x8] sm:$0xff]  ;;  %vm217_vm0 = vcmask 1041408  }
  0x14   :  { %262 = vmatprep.mubr.bf16.mxu0 %v2511_v0  ;;  %375 = vmatprep.mubr.bf16.mxu1 %v2511_v0  ;;  %v71_v3 = vld [vmem:[%s3118_s1 + $0x10] sm:$0xff]  ;;  %v85_v4 = vpack.c.bf16 %v70_v2, %v69_v1  ;;  %v72_v5 = vld [vmem:[%s3118_s1 + $0x18] sm:$0xff]  ;;  %v73_v6 = vld [vmem:[%s3118_s1 + $0x20] sm:$0xff]  ;;  %vm117_vm1 = vcmask 130048   ;;  %vm200_vm2 = vcmask 162816  }
  0x15   :  { %2305 = vset.pattern.permute.xlu1 %v2511_v0  ;;  %2304 = vset.pattern.permute.xlu0 %v2511_v0  ;;  %v74_v7 = vld [vmem:[%s3118_s1 + $0x28] sm:$0xff]  ;;  %v75_v9 = vld [vmem:[%s3118_s1 + $0x30] sm:$0xff]  ;;  %v76_v10 = vld [vmem:[%s3118_s1 + $0x38] sm:$0xff]  ;;  %v86_v11 = vpack.c.bf16 %v72_v5, %v71_v3 }
  0x16   :  { %v87_v8 = vpack.c.bf16 %v74_v7, %v73_v6  ;;  %101 = vrot.lane.b32.xlu0 %v85_v4, %s2510_s16  ;;  %v88_v12 = vpack.c.bf16 %v76_v10, %v75_v9  ;;  %v77_v13 = vld [vmem:[%s3118_s1 + $0x40] sm:$0xff]  ;;  %v78_v14 = vld [vmem:[%s3118_s1 + $0x48] sm:$0xff]  ;;  %v79_v15 = vld [vmem:[%s3118_s1 + $0x50] sm:$0xff] }
  0x17   :  { %v80_v16 = vld [vmem:[%s3118_s1 + $0x58] sm:$0xff]  ;;  %v81_v17 = vld [vmem:[%s3118_s1 + $0x60] sm:$0xff]  ;;  %v89_v19 = vpack.c.bf16 %v78_v14, %v77_v13  ;;  %v82_v24 = vld [vmem:[%s3118_s1 + $0x68] sm:$0xff] }
  0x18   :  { %105 = vrot.lane.b32.xlu1 %v87_v8, %s2510_s16  ;;  %v2306_v18 = vld [vmem:[%s3119_s2 + $0x4] ss:$16 sps:$4 sm:$0xff]   ;;  %v2308_v20 = vld [vmem:[%s3119_s2 + $0xc] ss:$16 sps:$4 sm:$0xff]   ;;  %v2310_v21 = vld [vmem:[%s3119_s2] ss:$16 sps:$4 sm:$0xff]   ;;  %v90_v23 = vpack.c.bf16 %v80_v16, %v79_v15  ;;  %v91_v33 = vpack.c.bf16 %v82_v24, %v81_v17  ;;  %v150_v16 = vlaneseq }
  0x19   :  { %v2311_v22 = vld [vmem:[%s3119_s2 + $0x8] ss:$16 sps:$4 sm:$0xff]   ;;  %230 = vmatprep.subr.bf16.mxu0 %v2306_v18  ;;  %v146_v25 = vld [vmem:[%s3119_s2 + $0x20] sm:$0x33]  ;;  %v83_v27 = vld [vmem:[%s3118_s1 + $0x70] sm:$0xff]  ;;  %343 = vmatprep.subr.bf16.mxu1 %v2308_v20 }
  0x1a   :  { %103 = vrot.lane.b32.xlu0 %v86_v11, %s2510_s16  ;;  %v147_v26 = vld [vmem:[%s3119_s2 + $0x28] sm:$0x33]  ;;  %v84_v28 = vld [vmem:[%s3118_s1 + $0x78] sm:$0xff]  ;;  %231 = vmatpush1.bf16.msra.mxu0 %v2310_v21  ;;  %v2086_v29 = vcombine.high %v146_v25, %v146_v25  ;;  %v2085_v31 = vcombine.low %v146_v25, %v146_v25  ;;  %v45_v37 = vld [vmem:[%s3117_s0] sm:$0xff]  ;;  %v151_v17 = vshrl.u32 %v150_v16, 7 }
  0x1b   :  { %v2088_v30 = vcombine.high %v147_v26, %v147_v26  ;;  %344 = vmatpush1.bf16.msra.mxu1 %v2311_v22  ;;  %v2087_v32 = vcombine.low %v147_v26, %v147_v26  ;;  %v92_v35 = vpack.c.bf16 %v84_v28, %v83_v27  ;;  %v46_v38 = vld [vmem:[%s3117_s0 + $0x8] sm:$0xff]  ;;  %v47_v41 = vld [vmem:[%s3117_s0 + $0x10] sm:$0xff]  ;;  %v48_v42 = vld [vmem:[%s3117_s0 + $0x18] sm:$0xff] }
  0x1c   :  { %107 = vrot.lane.b32.xlu1 %v88_v12, %s2510_s16  ;;  %2089 = vmatprep.subr.msk.bf16.mxu0 %vm217_vm0, %v2086_v29  ;;  %v219_v34 = vsel %vm217_vm0, %v2085_v31, 0  ;;  %v61_v39 = vpack.c.bf16 %v46_v38, %v45_v37  ;;  %v62_v44 = vpack.c.bf16 %v48_v42, %v47_v41  ;;  %v49_v47 = vld [vmem:[%s3117_s0 + $0x20] sm:$0xff]  ;;  %v50_v48 = vld [vmem:[%s3117_s0 + $0x28] sm:$0xff]  ;;  %v51_v52 = vld [vmem:[%s3117_s0 + $0x30] sm:$0xff]  ;;  %v152_v18 = vsub.s32 0, %v151_v17 }
  0x1d   :  { %2098 = vmatprep.subr.msk.bf16.mxu1 %vm217_vm0, %v2088_v30  ;;  %v225_v36 = vsel %vm217_vm0, %v2087_v32, 0  ;;  %v63_v49 = vpack.c.bf16 %v50_v48, %v49_v47  ;;  %v52_v53 = vld [vmem:[%s3117_s0 + $0x38] sm:$0xff]  ;;  %v53_v57 = vld [vmem:[%s3117_s0 + $0x40] sm:$0xff]  ;;  %v54_v58 = vld [vmem:[%s3117_s0 + $0x48] sm:$0xff]  ;;  %v164_v21 = vsub.s32 3, %v151_v17 }
  0x1e   :  { %109 = vrot.lane.b32.xlu0 %v89_v19, %s2510_s16  ;;  %233 = vmatpush1.bf16.msra.mxu0 %v219_v34  ;;  %v64_v54 = vpack.c.bf16 %v52_v53, %v51_v52  ;;  %v65_v59 = vpack.c.bf16 %v54_v58, %v53_v57  ;;  %v55_v62 = vld [vmem:[%s3117_s0 + $0x50] sm:$0xff]  ;;  %v56_v63 = vld [vmem:[%s3117_s0 + $0x58] sm:$0xff]  ;;  %v57_v4 = vld [vmem:[%s3117_s0 + $0x60] sm:$0xff]  ;;  %v160_v19 = vsub.s32 2, %v151_v17 }
  0x1f   :  { %346 = vmatpush1.bf16.msra.mxu1 %v225_v36  ;;  %v66_v1 = vpack.c.bf16 %v56_v63, %v55_v62  ;;  %v58_v5 = vld [vmem:[%s3117_s0 + $0x68] sm:$0xff]  ;;  %v59_v9 = vld [vmem:[%s3117_s0 + $0x70] sm:$0xff]  ;;  %v60_v10 = vld [vmem:[%s3117_s0 + $0x78] sm:$0xff] }
  0x20   :  { %111 = vrot.lane.b32.xlu1 %v90_v23, %s2510_s16  ;;  %v67_v6 = vpack.c.bf16 %v58_v5, %v57_v4  ;;  %v68_v11 = vpack.c.bf16 %v60_v10, %v59_v9  ;;  %v2318_v14 = vld [vmem:[#allocation2 + $0x4] ss:$16 sps:$4 sm:$0xff]   ;;  %v2321_v15 = vld [vmem:[#allocation2 + $0xc] ss:$16 sps:$4 sm:$0xff]   ;;  %v148_v20 = vld [vmem:[%s3120_s3] sm:$0xf] }
  0x21   :  { %v2742_v22 = vrot.slane %v148_v20, %v152_v18  ;;  %v2744_v23 = vrot.slane %v148_v20, %v160_v19  ;;  %v2748_v25 = vrot.slane %v148_v20, %v164_v21 }
  0x22   :  { %113 = vrot.lane.b32.xlu0 %v91_v33, %s2510_s16 }
  0x24   :  { %115 = vrot.lane.b32.xlu1 %v92_v35, %s2510_s16  ;;  %s2512_s16 = smov [#allocation5]  }
  0x25   :  { %s2072_s24 = sshll.u32 %s2512_s16, 4  ;;  %s2073_s24 = int_to_ptr.vmem [resolvable:$true] %s2072_s24 }
  0x26   :  { %s2486_s25 = scalar_lea.vmem %s2073_s24, 32  ;;  %p2487_p9 = scmp.lt.s32.totalorder %s2073_s24, %s2073_s24 }
  0x88   :  { %v102_v40 = vpop.permute.xlu0 %101 }
  0x89   :  { %v120_v43 = vsel %vm117_vm1, %v61_v39, %v102_v40 }
  0x8a   :  { %2090 = vmatmul.mubr.msk.bf16.vlgmr.msra.gmra.mrb[0].mxu0 %vm200_vm2, %v120_v43  ;;  %2099 = vmatmul.mubr.msk.bf16.vlgmr.msra.gmra.mrb[0].mxu1 %vm200_vm2, %v120_v43  ;;  %v106_v50 = vpop.permute.xlu1 %105 }
  0x8b   :  { %272 = vmatprep.mubr.bf16.mxu0 %v2511_v0  ;;  %385 = vmatprep.mubr.bf16.mxu1 %v2511_v0  ;;  %v126_v51 = vsel %vm117_vm1, %v63_v49, %v106_v50 }
  0x8c   :  { %v104_v45 = vpop.permute.xlu0 %103 }
  0x8d   :  { %v123_v46 = vsel %vm117_vm1, %v62_v44, %v104_v45 }
  0x8e   :  { %v108_v55 = vpop.permute.xlu1 %107 }
  0x8f   :  { %v129_v56 = vsel %vm117_vm1, %v64_v54, %v108_v55 }
  0x90   :  { %v110_v60 = vpop.permute.xlu0 %109 }
  0x91   :  { %v132_v61 = vsel %vm117_vm1, %v65_v59, %v110_v60 }
  0x92   :  { %2091 = vmatmul.mubr.msk.bf16.gmra.mrb[4].mxu0 %vm200_vm2, %v123_v46  ;;  %2100 = vmatmul.mubr.msk.bf16.gmra.mrb[4].mxu1 %vm200_vm2, %v123_v46  ;;  %v112_v2 = vpop.permute.xlu1 %111 }
  0x93   :  { %282 = vmatprep.mubr.bf16.mxu0 %v2511_v0  ;;  %395 = vmatprep.mubr.bf16.mxu1 %v2511_v0  ;;  %v135_v3 = vsel %vm117_vm1, %v66_v1, %v112_v2 }
  0x94   :  { %v114_v7 = vpop.permute.xlu0 %113 }
  0x95   :  { %v138_v8 = vsel %vm117_vm1, %v67_v6, %v114_v7 }
  0x96   :  { %v116_v12 = vpop.permute.xlu1 %115 }
  0x97   :  { %v141_v13 = vsel %vm117_vm1, %v68_v11, %v116_v12 }
  0x9a   :  { %2092 = vmatmul.mubr.msk.bf16.gmra.mrb[8].mxu0 %vm200_vm2, %v126_v51  ;;  %2101 = vmatmul.mubr.msk.bf16.gmra.mrb[8].mxu1 %vm200_vm2, %v126_v51 }
  0x9b   :  { %292 = vmatprep.mubr.bf16.mxu0 %v2511_v0  ;;  %405 = vmatprep.mubr.bf16.mxu1 %v2511_v0 }
  0xa2   :  { %2093 = vmatmul.mubr.msk.bf16.gmra.mrb[12].mxu0 %vm200_vm2, %v129_v56  ;;  %2102 = vmatmul.mubr.msk.bf16.gmra.mrb[12].mxu1 %vm200_vm2, %v129_v56 }
  0xa3   :  { %302 = vmatprep.mubr.bf16.mxu0 %v2511_v0  ;;  %415 = vmatprep.mubr.bf16.mxu1 %v2511_v0 }
  0xaa   :  { %2094 = vmatmul.mubr.msk.bf16.gmra.mrb[16].mxu0 %vm200_vm2, %v132_v61  ;;  %2103 = vmatmul.mubr.msk.bf16.gmra.mrb[16].mxu1 %vm200_vm2, %v132_v61 }
  0xab   :  { %312 = vmatprep.mubr.bf16.mxu0 %v2511_v0  ;;  %425 = vmatprep.mubr.bf16.mxu1 %v2511_v0 }
  0xb2   :  { %2095 = vmatmul.mubr.msk.bf16.gmra.mrb[20].mxu0 %vm200_vm2, %v135_v3  ;;  %2104 = vmatmul.mubr.msk.bf16.gmra.mrb[20].mxu1 %vm200_vm2, %v135_v3 }
  0xb3   :  { %322 = vmatprep.mubr.bf16.mxu0 %v2511_v0  ;;  %435 = vmatprep.mubr.bf16.mxu1 %v2511_v0 }
  0xba   :  { %2096 = vmatmul.mubr.msk.bf16.gmra.mrb[24].mxu0 %vm200_vm2, %v138_v8  ;;  %2105 = vmatmul.mubr.msk.bf16.gmra.mrb[24].mxu1 %vm200_vm2, %v138_v8 }
  0xbb   :  { %332 = vmatprep.mubr.bf16.mxu0 %v2511_v0  ;;  %445 = vmatprep.mubr.bf16.mxu1 %v2511_v0  ;;  %v156_v0 = vsub.s32 1, %v151_v17 }
  0xbd   :  { %v2746_v24 = vrot.slane %v148_v20, %v156_v0 }
  0xc2   :  { %2097 = vmatmul.mubr.msk.bf16.gmra.mrb[28].mxu0 %vm200_vm2, %v141_v13  ;;  %2106 = vmatmul.mubr.msk.bf16.gmra.mrb[28].mxu1 %vm200_vm2, %v141_v13 }
  0xc3   :  { %1448 = vmatprep.mubr.bf16.mxu1 %v2318_v14  ;;  %1673 = vmatprep.mubr.bf16.mxu0 %v2321_v15 }
 0x15d   :  { %v264_v26 = vpop.f32.mrb[0].mxu0  ;;  %v377_v27 = vpop.f32.mrb[0].mxu1 }
 0x15e   :  { %v265_v28 = vadd.f32 %v264_v26, %v2742_v22  ;;  %v378_v29 = vadd.f32 %v377_v27, %v2744_v23  ;;  %v266_v30 = vpop.f32.mrb[1].mxu0  ;;  %v379_v31 = vpop.f32.mrb[1].mxu1 }
 0x15f   :  { %v267_v32 = vadd.f32 %v266_v30, %v2746_v24  ;;  %v380_v33 = vadd.f32 %v379_v31, %v2748_v25  ;;  %v268_v34 = vpop.f32.mrb[2].mxu0  ;;  %v381_v35 = vpop.f32.mrb[2].mxu1 }
 0x160   :  { %v269_v36 = vadd.f32 %v268_v34, %v2742_v22  ;;  %v382_v37 = vadd.f32 %v381_v35, %v2744_v23  ;;  %v270_v38 = vpop.f32.mrb[3].mxu0  ;;  %v383_v39 = vpop.f32.mrb[3].mxu1  ;;  %v456_v42 = vmax.f32 %v265_v28, 0.0  ;;  %v458_v43 = vmax.f32 %v378_v29, 0.0 }
 0x161   :  { %v271_v40 = vadd.f32 %v270_v38, %v2746_v24  ;;  %v384_v41 = vadd.f32 %v383_v39, %v2748_v25  ;;  %v457_v46 = vmax.f32 %v267_v32, 0.0  ;;  %v459_v47 = vmax.f32 %v380_v33, 0.0 }
 0x162   :  { %v460_v44 = vmax.f32 %v269_v36, 0.0  ;;  %v462_v45 = vmax.f32 %v382_v37, 0.0 }
 0x163   :  { %v461_v48 = vmax.f32 %v271_v40, 0.0  ;;  %v463_v49 = vmax.f32 %v384_v41, 0.0 }
 0x164   :  { %v616_v50 = vpack.c.bf16 %v460_v44, %v456_v42  ;;  %v618_v51 = vpack.c.bf16 %v462_v45, %v458_v43 }
 0x165   :  { %v617_v52 = vpack.c.bf16 %v461_v48, %v457_v46  ;;  %v619_v53 = vpack.c.bf16 %v463_v49, %v459_v47  ;;  %v274_v54 = vpop.f32.mrb[4].mxu0  ;;  %v387_v55 = vpop.f32.mrb[4].mxu1 }
 0x166   :  { %v275_v56 = vadd.f32 %v274_v54, %v2742_v22  ;;  %v388_v57 = vadd.f32 %v387_v55, %v2744_v23  ;;  %v276_v58 = vpop.f32.mrb[5].mxu0  ;;  %v389_v59 = vpop.f32.mrb[5].mxu1 }
 0x167   :  { %v277_v60 = vadd.f32 %v276_v58, %v2746_v24  ;;  %v390_v61 = vadd.f32 %v389_v59, %v2748_v25  ;;  %v278_v62 = vpop.f32.mrb[6].mxu0  ;;  %v391_v63 = vpop.f32.mrb[6].mxu1  ;;  %1416 = vmatprep.subr.bf16.mxu1 %v617_v52  ;;  %1641 = vmatprep.subr.bf16.mxu0 %v619_v53 }
 0x168   :  { %v279_v1 = vadd.f32 %v278_v62, %v2742_v22  ;;  %v392_v2 = vadd.f32 %v391_v63, %v2744_v23  ;;  %v280_v3 = vpop.f32.mrb[7].mxu0  ;;  %v393_v4 = vpop.f32.mrb[7].mxu1  ;;  %1417 = vmatpush1.bf16.xpose.msra.mxu1 %v616_v50  ;;  %1642 = vmatpush1.bf16.xpose.msra.mxu0 %v618_v51  ;;  %v464_v7 = vmax.f32 %v275_v56, 0.0  ;;  %v466_v8 = vmax.f32 %v388_v57, 0.0 }
 0x169   :  { %v281_v5 = vadd.f32 %v280_v3, %v2746_v24  ;;  %v394_v6 = vadd.f32 %v393_v4, %v2748_v25  ;;  %v465_v11 = vmax.f32 %v277_v60, 0.0  ;;  %v467_v12 = vmax.f32 %v390_v61, 0.0  ;;  %v649_v60 = vld [vmem:[%s3122_s5 + $0x8] sm:$0xff]  ;;  %v648_v61 = vld [vmem:[%s3122_s5] sm:$0xff] }
 0x16a   :  { %v468_v9 = vmax.f32 %v279_v1, 0.0  ;;  %v470_v10 = vmax.f32 %v392_v2, 0.0  ;;  %703 = vperm.xlu1 %2305, %v649_v60   ;;  %698 = vperm.xlu0 %2304, %v648_v61  }
 0x16b   :  { %v469_v13 = vmax.f32 %v281_v5, 0.0  ;;  %v471_v14 = vmax.f32 %v394_v6, 0.0 }
 0x16c   :  { %v620_v15 = vpack.c.bf16 %v468_v9, %v464_v7  ;;  %v622_v16 = vpack.c.bf16 %v470_v10, %v466_v8 }
 0x16d   :  { %v621_v17 = vpack.c.bf16 %v469_v13, %v465_v11  ;;  %v623_v18 = vpack.c.bf16 %v471_v14, %v467_v12  ;;  %v284_v19 = vpop.f32.mrb[8].mxu0  ;;  %v397_v20 = vpop.f32.mrb[8].mxu1 }
 0x16e   :  { %v285_v0 = vadd.f32 %v284_v19, %v2742_v22  ;;  %v398_v21 = vadd.f32 %v397_v20, %v2744_v23  ;;  %v286_v26 = vpop.f32.mrb[9].mxu0  ;;  %v399_v27 = vpop.f32.mrb[9].mxu1 }
 0x16f   :  { %v287_v28 = vadd.f32 %v286_v26, %v2746_v24  ;;  %v400_v29 = vadd.f32 %v399_v27, %v2748_v25  ;;  %v288_v30 = vpop.f32.mrb[10].mxu0  ;;  %v401_v31 = vpop.f32.mrb[10].mxu1  ;;  %1418 = vmatprep.subr.bf16.mxu1 %v621_v17  ;;  %1643 = vmatprep.subr.bf16.mxu0 %v623_v18  ;;  %v650_v26 = vld [vmem:[%s3122_s5 + $0x10] sm:$0xff] }
 0x170   :  { %v289_v32 = vadd.f32 %v288_v30, %v2742_v22  ;;  %v402_v33 = vadd.f32 %v401_v31, %v2744_v23  ;;  %v290_v34 = vpop.f32.mrb[11].mxu0  ;;  %v403_v35 = vpop.f32.mrb[11].mxu1  ;;  %1419 = vmatpush1.bf16.xpose.msra.mxu1 %v620_v15  ;;  %1644 = vmatpush1.bf16.xpose.msra.mxu0 %v622_v16  ;;  %v472_v38 = vmax.f32 %v285_v0, 0.0  ;;  %v474_v39 = vmax.f32 %v398_v21, 0.0  ;;  %v651_v31 = vld [vmem:[%s3122_s5 + $0x18] sm:$0xff] }
 0x171   :  { %v291_v36 = vadd.f32 %v290_v34, %v2746_v24  ;;  %v404_v37 = vadd.f32 %v403_v35, %v2748_v25  ;;  %v473_v42 = vmax.f32 %v287_v28, 0.0  ;;  %v475_v43 = vmax.f32 %v400_v29, 0.0  ;;  %708 = vperm.xlu1 %2305, %v650_v26   ;;  %713 = vperm.xlu0 %2304, %v651_v31  }
 0x172   :  { %v476_v40 = vmax.f32 %v289_v32, 0.0  ;;  %v478_v41 = vmax.f32 %v402_v33, 0.0 }
 0x173   :  { %v477_v44 = vmax.f32 %v291_v36, 0.0  ;;  %v479_v45 = vmax.f32 %v404_v37, 0.0 }
 0x174   :  { %v624_v46 = vpack.c.bf16 %v476_v40, %v472_v38  ;;  %v626_v47 = vpack.c.bf16 %v478_v41, %v474_v39 }
 0x175   :  { %v625_v48 = vpack.c.bf16 %v477_v44, %v473_v42  ;;  %v627_v49 = vpack.c.bf16 %v479_v45, %v475_v43  ;;  %v294_v50 = vpop.f32.mrb[12].mxu0  ;;  %v407_v51 = vpop.f32.mrb[12].mxu1  ;;  %v652_v42 = vld [vmem:[%s3122_s5 + $0x20] sm:$0xff]  ;;  %v653_v43 = vld [vmem:[%s3122_s5 + $0x28] sm:$0xff] }
 0x176   :  { %v295_v52 = vadd.f32 %v294_v50, %v2742_v22  ;;  %v408_v53 = vadd.f32 %v407_v51, %v2744_v23  ;;  %v296_v54 = vpop.f32.mrb[13].mxu0  ;;  %v409_v55 = vpop.f32.mrb[13].mxu1  ;;  %718 = vperm.xlu1 %2305, %v652_v42   ;;  %723 = vperm.xlu0 %2304, %v653_v43  }
 0x177   :  { %v297_v56 = vadd.f32 %v296_v54, %v2746_v24  ;;  %v410_v57 = vadd.f32 %v409_v55, %v2748_v25  ;;  %v298_v58 = vpop.f32.mrb[14].mxu0  ;;  %v411_v59 = vpop.f32.mrb[14].mxu1  ;;  %1420 = vmatprep.subr.bf16.mxu1 %v625_v48  ;;  %1645 = vmatprep.subr.bf16.mxu0 %v627_v49 }
 0x178   :  { %v299_v62 = vadd.f32 %v298_v58, %v2742_v22  ;;  %v412_v63 = vadd.f32 %v411_v59, %v2744_v23  ;;  %v300_v1 = vpop.f32.mrb[15].mxu0  ;;  %v413_v2 = vpop.f32.mrb[15].mxu1  ;;  %1421 = vmatpush1.bf16.xpose.msra.mxu1 %v624_v46  ;;  %1646 = vmatpush1.bf16.xpose.msra.mxu0 %v626_v47  ;;  %v480_v5 = vmax.f32 %v295_v52, 0.0  ;;  %v482_v6 = vmax.f32 %v408_v53, 0.0  ;;  %v654_v58 = vld [vmem:[%s3122_s5 + $0x30] sm:$0xff] }
 0x179   :  { %v301_v3 = vadd.f32 %v300_v1, %v2746_v24  ;;  %v414_v4 = vadd.f32 %v413_v2, %v2748_v25  ;;  %v481_v9 = vmax.f32 %v297_v56, 0.0  ;;  %v483_v10 = vmax.f32 %v410_v57, 0.0 }
 0x17a   :  { %v484_v7 = vmax.f32 %v299_v62, 0.0  ;;  %v486_v8 = vmax.f32 %v412_v63, 0.0  ;;  %v655_v63 = vld [vmem:[%s3122_s5 + $0x38] sm:$0xff]  ;;  %728 = vperm.xlu1 %2305, %v654_v58  }
 0x17b   :  { %v485_v11 = vmax.f32 %v301_v3, 0.0  ;;  %v487_v12 = vmax.f32 %v414_v4, 0.0  ;;  %733 = vperm.xlu0 %2304, %v655_v63  }
 0x17c   :  { %v628_v13 = vpack.c.bf16 %v484_v7, %v480_v5  ;;  %v630_v14 = vpack.c.bf16 %v486_v8, %v482_v6 }
 0x17d   :  { %v629_v15 = vpack.c.bf16 %v485_v11, %v481_v9  ;;  %v631_v16 = vpack.c.bf16 %v487_v12, %v483_v10  ;;  %v304_v17 = vpop.f32.mrb[16].mxu0  ;;  %v417_v18 = vpop.f32.mrb[16].mxu1  ;;  %v656_v11 = vld [vmem:[%s3122_s5 + $0x40] sm:$0xff]  ;;  %v657_v12 = vld [vmem:[%s3122_s5 + $0x48] sm:$0xff] }
 0x17e   :  { %v305_v19 = vadd.f32 %v304_v17, %v2742_v22  ;;  %v418_v20 = vadd.f32 %v417_v18, %v2744_v23  ;;  %v306_v0 = vpop.f32.mrb[17].mxu0  ;;  %v419_v21 = vpop.f32.mrb[17].mxu1  ;;  %738 = vperm.xlu1 %2305, %v656_v11  }
 0x17f   :  { %v307_v27 = vadd.f32 %v306_v0, %v2746_v24  ;;  %v420_v28 = vadd.f32 %v419_v21, %v2748_v25  ;;  %v308_v29 = vpop.f32.mrb[18].mxu0  ;;  %v421_v30 = vpop.f32.mrb[18].mxu1  ;;  %1422 = vmatprep.subr.bf16.mxu1 %v629_v15  ;;  %1647 = vmatprep.subr.bf16.mxu0 %v631_v16 }
 0x180   :  { %v309_v32 = vadd.f32 %v308_v29, %v2742_v22  ;;  %v422_v33 = vadd.f32 %v421_v30, %v2744_v23  ;;  %v310_v34 = vpop.f32.mrb[19].mxu0  ;;  %v423_v35 = vpop.f32.mrb[19].mxu1  ;;  %1423 = vmatpush1.bf16.xpose.msra.mxu1 %v628_v13  ;;  %1648 = vmatpush1.bf16.xpose.msra.mxu0 %v630_v14  ;;  %v488_v38 = vmax.f32 %v305_v19, 0.0  ;;  %v490_v39 = vmax.f32 %v418_v20, 0.0  ;;  %v658_v30 = vld [vmem:[%s3122_s5 + $0x50] sm:$0xff] }
 0x181   :  { %v311_v36 = vadd.f32 %v310_v34, %v2746_v24  ;;  %v424_v37 = vadd.f32 %v423_v35, %v2748_v25  ;;  %v489_v44 = vmax.f32 %v307_v27, 0.0  ;;  %v491_v45 = vmax.f32 %v420_v28, 0.0  ;;  %743 = vperm.xlu0 %2304, %v657_v12   ;;  %v659_v35 = vld [vmem:[%s3122_s5 + $0x58] sm:$0xff] }
 0x182   :  { %v492_v40 = vmax.f32 %v309_v32, 0.0  ;;  %v494_v41 = vmax.f32 %v422_v33, 0.0  ;;  %748 = vperm.xlu1 %2305, %v658_v30   ;;  %v2322_v30 = vld [vmem:[#allocation2 + $0x24] ss:$16 sps:$4 sm:$0xff]  }
 0x183   :  { %v493_v46 = vmax.f32 %v311_v36, 0.0  ;;  %v495_v47 = vmax.f32 %v424_v37, 0.0 }
 0x184   :  { %v632_v48 = vpack.c.bf16 %v492_v40, %v488_v38  ;;  %v634_v49 = vpack.c.bf16 %v494_v41, %v490_v39 }
 0x185   :  { %v633_v50 = vpack.c.bf16 %v493_v46, %v489_v44  ;;  %v635_v51 = vpack.c.bf16 %v495_v47, %v491_v45  ;;  %v314_v52 = vpop.f32.mrb[20].mxu0  ;;  %v427_v53 = vpop.f32.mrb[20].mxu1  ;;  %753 = vperm.xlu0 %2304, %v659_v35   ;;  %v660_v46 = vld [vmem:[%s3122_s5 + $0x60] sm:$0xff]  ;;  %v661_v47 = vld [vmem:[%s3122_s5 + $0x68] sm:$0xff] }
 0x186   :  { %v315_v54 = vadd.f32 %v314_v52, %v2742_v22  ;;  %v428_v55 = vadd.f32 %v427_v53, %v2744_v23  ;;  %v316_v56 = vpop.f32.mrb[21].mxu0  ;;  %v429_v57 = vpop.f32.mrb[21].mxu1  ;;  %758 = vperm.xlu1 %2305, %v660_v46   ;;  %v673_v35 = vld [vmem:[%s3122_s5 + $0xc8] sm:$0xff]  ;;  %v2334_v46 = vld [vmem:[#allocation2 + $0x64] ss:$16 sps:$4 sm:$0xff]  }
 0x187   :  { %v317_v59 = vadd.f32 %v316_v56, %v2746_v24  ;;  %v430_v60 = vadd.f32 %v429_v57, %v2748_v25  ;;  %v318_v61 = vpop.f32.mrb[22].mxu0  ;;  %v431_v62 = vpop.f32.mrb[22].mxu1  ;;  %1424 = vmatprep.subr.bf16.mxu1 %v633_v50  ;;  %1649 = vmatprep.subr.bf16.mxu0 %v635_v51 }
 0x188   :  { %v319_v1 = vadd.f32 %v318_v61, %v2742_v22  ;;  %v432_v2 = vadd.f32 %v431_v62, %v2744_v23  ;;  %v320_v3 = vpop.f32.mrb[23].mxu0  ;;  %v433_v4 = vpop.f32.mrb[23].mxu1  ;;  %1425 = vmatpush1.bf16.xpose.msra.mxu1 %v632_v48  ;;  %1650 = vmatpush1.bf16.xpose.msra.mxu0 %v634_v49  ;;  %v496_v7 = vmax.f32 %v315_v54, 0.0  ;;  %v498_v8 = vmax.f32 %v428_v55, 0.0  ;;  %v662_v62 = vld [vmem:[%s3122_s5 + $0x70] sm:$0xff] }
 0x189   :  { %v321_v5 = vadd.f32 %v320_v3, %v2746_v24  ;;  %v434_v6 = vadd.f32 %v433_v4, %v2748_v25  ;;  %v497_v13 = vmax.f32 %v317_v59, 0.0  ;;  %v499_v14 = vmax.f32 %v430_v60, 0.0  ;;  %763 = vperm.xlu0 %2304, %v661_v47   ;;  %v663_v4 = vld [vmem:[%s3122_s5 + $0x78] sm:$0xff] }
 0x18a   :  { %v500_v9 = vmax.f32 %v319_v1, 0.0  ;;  %v502_v10 = vmax.f32 %v432_v2, 0.0  ;;  %768 = vperm.xlu1 %2305, %v662_v62   ;;  %v2336_v47 = vld [vmem:[#allocation2 + $0x6c] ss:$16 sps:$4 sm:$0xff]   ;;  %v2346_v62 = vld [vmem:[#allocation2 + $0xa4] ss:$16 sps:$4 sm:$0xff]  }
 0x18b   :  { %v501_v15 = vmax.f32 %v321_v5, 0.0  ;;  %v503_v16 = vmax.f32 %v434_v6, 0.0 }
 0x18c   :  { %v636_v17 = vpack.c.bf16 %v500_v9, %v496_v7  ;;  %v638_v18 = vpack.c.bf16 %v502_v10, %v498_v8 }
 0x18d   :  { %v637_v19 = vpack.c.bf16 %v501_v15, %v497_v13  ;;  %v639_v20 = vpack.c.bf16 %v503_v16, %v499_v14  ;;  %v324_v0 = vpop.f32.mrb[24].mxu0  ;;  %v437_v21 = vpop.f32.mrb[24].mxu1  ;;  %773 = vperm.xlu0 %2304, %v663_v4   ;;  %v689_v4 = vld [vmem:[%s3122_s5 + $0x148] sm:$0xff] }
 0x18e   :  { %v325_v26 = vadd.f32 %v324_v0, %v2742_v22  ;;  %v438_v27 = vadd.f32 %v437_v21, %v2744_v23  ;;  %v326_v28 = vpop.f32.mrb[25].mxu0  ;;  %v439_v29 = vpop.f32.mrb[25].mxu1  ;;  %v666_v0 = vld [vmem:[%s3122_s5 + $0x90] sm:$0xff]  ;;  %v667_v21 = vld [vmem:[%s3122_s5 + $0x98] sm:$0xff] }
 0x18f   :  { %v327_v31 = vadd.f32 %v326_v28, %v2746_v24  ;;  %v440_v32 = vadd.f32 %v439_v29, %v2748_v25  ;;  %v328_v33 = vpop.f32.mrb[26].mxu0  ;;  %v441_v34 = vpop.f32.mrb[26].mxu1  ;;  %1426 = vmatprep.subr.bf16.mxu1 %v637_v19  ;;  %1651 = vmatprep.subr.bf16.mxu0 %v639_v20  ;;  %v2316_v28 = vld [vmem:[#allocation2] ss:$16 sps:$4 sm:$0xff]   ;;  %v2319_v29 = vld [vmem:[#allocation2 + $0x8] ss:$16 sps:$4 sm:$0xff]  }
 0x190   :  { %v329_v36 = vadd.f32 %v328_v33, %v2742_v22  ;;  %v442_v37 = vadd.f32 %v441_v34, %v2744_v23  ;;  %v330_v38 = vpop.f32.mrb[27].mxu0  ;;  %v443_v39 = vpop.f32.mrb[27].mxu1  ;;  %1427 = vmatpush1.bf16.xpose.msra.mxu1 %v636_v17  ;;  %1652 = vmatpush1.bf16.xpose.msra.mxu0 %v638_v18  ;;  %v504_v42 = vmax.f32 %v325_v26, 0.0  ;;  %v506_v43 = vmax.f32 %v438_v27, 0.0  ;;  %v668_v26 = vld [vmem:[%s3122_s5 + $0xa0] sm:$0xff]  ;;  %v669_v27 = vld [vmem:[%s3122_s5 + $0xa8] sm:$0xff] }
 0x191   :  { %v331_v40 = vadd.f32 %v330_v38, %v2746_v24  ;;  %v444_v41 = vadd.f32 %v443_v39, %v2748_v25  ;;  %v505_v48 = vmax.f32 %v327_v31, 0.0  ;;  %v507_v49 = vmax.f32 %v440_v32, 0.0  ;;  %v2324_v31 = vld [vmem:[#allocation2 + $0x2c] ss:$16 sps:$4 sm:$0xff]   ;;  %v670_v32 = vld [vmem:[%s3122_s5 + $0xb0] sm:$0xff]  ;;  %v672_v34 = vld [vmem:[%s3122_s5 + $0xc0] sm:$0xff] }
 0x192   :  { %v508_v44 = vmax.f32 %v329_v36, 0.0  ;;  %v510_v45 = vmax.f32 %v442_v37, 0.0  ;;  %v671_v33 = vld [vmem:[%s3122_s5 + $0xb8] sm:$0xff]  ;;  %v2326_v36 = vld [vmem:[#allocation2 + $0x20] ss:$16 sps:$4 sm:$0xff]  }
 0x193   :  { %v509_v50 = vmax.f32 %v331_v40, 0.0  ;;  %v511_v51 = vmax.f32 %v444_v41, 0.0  ;;  %v2327_v37 = vld [vmem:[#allocation2 + $0x28] ss:$16 sps:$4 sm:$0xff]   ;;  %v2328_v38 = vld [vmem:[#allocation2 + $0x44] ss:$16 sps:$4 sm:$0xff]  }
 0x194   :  { %v640_v52 = vpack.c.bf16 %v508_v44, %v504_v42  ;;  %v642_v53 = vpack.c.bf16 %v510_v45, %v506_v43  ;;  %v2330_v39 = vld [vmem:[#allocation2 + $0x4c] ss:$16 sps:$4 sm:$0xff]   ;;  %v674_v40 = vld [vmem:[%s3122_s5 + $0xd0] sm:$0xff]  ;;  %v676_v42 = vld [vmem:[%s3122_s5 + $0xe0] sm:$0xff] }
 0x195   :  { %v641_v54 = vpack.c.bf16 %v509_v50, %v505_v48  ;;  %v643_v55 = vpack.c.bf16 %v511_v51, %v507_v49  ;;  %v334_v56 = vpop.f32.mrb[28].mxu0  ;;  %v447_v57 = vpop.f32.mrb[28].mxu1  ;;  %v675_v41 = vld [vmem:[%s3122_s5 + $0xd8] sm:$0xff]  ;;  %v677_v43 = vld [vmem:[%s3122_s5 + $0xe8] sm:$0xff]  ;;  %v2332_v44 = vld [vmem:[#allocation2 + $0x40] ss:$16 sps:$4 sm:$0xff]  }
 0x196   :  { %v335_v58 = vadd.f32 %v334_v56, %v2742_v22  ;;  %v448_v59 = vadd.f32 %v447_v57, %v2744_v23  ;;  %v336_v60 = vpop.f32.mrb[29].mxu0  ;;  %v449_v61 = vpop.f32.mrb[29].mxu1  ;;  %v2333_v45 = vld [vmem:[#allocation2 + $0x48] ss:$16 sps:$4 sm:$0xff]   ;;  %v678_v48 = vld [vmem:[%s3122_s5 + $0xf0] sm:$0xff]  ;;  %v680_v50 = vld [vmem:[%s3122_s5 + $0x100] sm:$0xff] }
 0x197   :  { %v337_v63 = vadd.f32 %v336_v60, %v2746_v24  ;;  %v450_v1 = vadd.f32 %v449_v61, %v2748_v25  ;;  %v338_v2 = vpop.f32.mrb[30].mxu0  ;;  %v451_v3 = vpop.f32.mrb[30].mxu1  ;;  %1428 = vmatprep.subr.bf16.mxu1 %v641_v54  ;;  %1653 = vmatprep.subr.bf16.mxu0 %v643_v55  ;;  %v679_v49 = vld [vmem:[%s3122_s5 + $0xf8] sm:$0xff]  ;;  %v681_v51 = vld [vmem:[%s3122_s5 + $0x108] sm:$0xff]  ;;  %v2340_v54 = vld [vmem:[#allocation2 + $0x84] ss:$16 sps:$4 sm:$0xff]  }
 0x198   :  { %v339_v5 = vadd.f32 %v338_v2, %v2742_v22  ;;  %v452_v6 = vadd.f32 %v451_v3, %v2744_v23  ;;  %v340_v7 = vpop.f32.mrb[31].mxu0  ;;  %v453_v8 = vpop.f32.mrb[31].mxu1  ;;  %1429 = vmatpush1.bf16.xpose.msra.mxu1 %v640_v52  ;;  %1654 = vmatpush1.bf16.xpose.msra.mxu0 %v642_v53  ;;  %v512_v11 = vmax.f32 %v335_v58, 0.0  ;;  %v514_v12 = vmax.f32 %v448_v59, 0.0  ;;  %v664_v22 = vld [vmem:[%s3122_s5 + $0x80] sm:$0xff]  ;;  %v665_v23 = vld [vmem:[%s3122_s5 + $0x88] sm:$0xff] }
 0x199   :  { %v341_v9 = vadd.f32 %v340_v7, %v2746_v24  ;;  %v454_v10 = vadd.f32 %v453_v8, %v2748_v25  ;;  %v513_v15 = vmax.f32 %v337_v63, 0.0  ;;  %v515_v16 = vmax.f32 %v450_v1, 0.0  ;;  %778 = vperm.xlu1 %2305, %v664_v22   ;;  %783 = vperm.xlu0 %2304, %v665_v23   ;;  %v2338_v52 = vld [vmem:[#allocation2 + $0x60] ss:$16 sps:$4 sm:$0xff]   ;;  %v2339_v53 = vld [vmem:[#allocation2 + $0x68] ss:$16 sps:$4 sm:$0xff]  }
 0x19a   :  { %v516_v13 = vmax.f32 %v339_v5, 0.0  ;;  %v518_v14 = vmax.f32 %v452_v6, 0.0  ;;  %v2342_v55 = vld [vmem:[#allocation2 + $0x8c] ss:$16 sps:$4 sm:$0xff]   ;;  %v682_v56 = vld [vmem:[%s3122_s5 + $0x110] sm:$0xff]  ;;  %v684_v58 = vld [vmem:[%s3122_s5 + $0x120] sm:$0xff] }
 0x19b   :  { %v517_v17 = vmax.f32 %v341_v9, 0.0  ;;  %v519_v24 = vmax.f32 %v454_v10, 0.0  ;;  %v683_v57 = vld [vmem:[%s3122_s5 + $0x118] sm:$0xff]  ;;  %v685_v59 = vld [vmem:[%s3122_s5 + $0x128] sm:$0xff]  ;;  %v2344_v60 = vld [vmem:[#allocation2 + $0x80] ss:$16 sps:$4 sm:$0xff]  }
 0x19c   :  { %v644_v18 = vpack.c.bf16 %v516_v13, %v512_v11  ;;  %v646_v25 = vpack.c.bf16 %v518_v14, %v514_v12  ;;  %v2345_v61 = vld [vmem:[#allocation2 + $0x88] ss:$16 sps:$4 sm:$0xff]   ;;  %v2348_v63 = vld [vmem:[#allocation2 + $0xac] ss:$16 sps:$4 sm:$0xff]   ;;  %v686_v1 = vld [vmem:[%s3122_s5 + $0x130] sm:$0xff] }
 0x19d   :  { %v645_v19 = vpack.c.bf16 %v517_v17, %v513_v15  ;;  %v647_v20 = vpack.c.bf16 %v519_v24, %v515_v16  ;;  %788 = vperm.xlu1 %2305, %v666_v0   ;;  %793 = vperm.xlu0 %2304, %v667_v21   ;;  %v687_v2 = vld [vmem:[%s3122_s5 + $0x138] sm:$0xff]  ;;  %v688_v3 = vld [vmem:[%s3122_s5 + $0x140] sm:$0xff]  ;;  %v690_v9 = vld [vmem:[%s3122_s5 + $0x150] sm:$0xff] }
 0x19e   :  { %v2350_v5 = vld [vmem:[#allocation2 + $0xa0] ss:$16 sps:$4 sm:$0xff]   ;;  %v2351_v6 = vld [vmem:[#allocation2 + $0xa8] ss:$16 sps:$4 sm:$0xff]   ;;  %v2352_v7 = vld [vmem:[#allocation2 + $0xc4] ss:$16 sps:$4 sm:$0xff]  }
 0x19f   :  { %1430 = vmatprep.subr.bf16.mxu1 %v645_v19  ;;  %1655 = vmatprep.subr.bf16.mxu0 %v647_v20  ;;  %v2354_v8 = vld [vmem:[#allocation2 + $0xcc] ss:$16 sps:$4 sm:$0xff]   ;;  %v692_v11 = vld [vmem:[%s3122_s5 + $0x160] sm:$0xff]  ;;  %v2357_v14 = vld [vmem:[#allocation2 + $0xc8] ss:$16 sps:$4 sm:$0xff]  }
 0x1a0   :  { %1431 = vmatpush1.bf16.xpose.msra.mxu1 %v644_v18  ;;  %1656 = vmatpush1.bf16.xpose.msra.mxu0 %v646_v25  ;;  %v691_v10 = vld [vmem:[%s3122_s5 + $0x158] sm:$0xff]  ;;  %v693_v12 = vld [vmem:[%s3122_s5 + $0x168] sm:$0xff]  ;;  %v2356_v13 = vld [vmem:[#allocation2 + $0xc0] ss:$16 sps:$4 sm:$0xff]  }
 0x1a1   :  { %798 = vperm.xlu1 %2305, %v668_v26   ;;  %803 = vperm.xlu0 %2304, %v669_v27   ;;  %v2358_v22 = vld [vmem:[#allocation2 + $0xe4] ss:$16 sps:$4 sm:$0xff]   ;;  %v2360_v23 = vld [vmem:[#allocation2 + $0xec] ss:$16 sps:$4 sm:$0xff]   ;;  %v2362_v17 = vld [vmem:[#allocation2 + $0xe0] ss:$16 sps:$4 sm:$0xff]  }
 0x1a2   :  { %v694_v15 = vld [vmem:[%s3122_s5 + $0x170] sm:$0xff]  ;;  %v695_v16 = vld [vmem:[%s3122_s5 + $0x178] sm:$0xff] }
 0x1a3   :  { %v2363_v24 = vld [vmem:[#allocation2 + $0xe8] ss:$16 sps:$4 sm:$0xff]   ;;  %v2364_v18 = vld [vmem:[#allocation2 + $0x104] ss:$16 sps:$4 sm:$0xff]   ;;  %v2366_v25 = vld [vmem:[#allocation2 + $0x10c] ss:$16 sps:$4 sm:$0xff]  }
 0x1a4   :  { %v2368_v19 = vld [vmem:[#allocation2 + $0x100] ss:$16 sps:$4 sm:$0xff]   ;;  %v2369_v20 = vld [vmem:[#allocation2 + $0x108] ss:$16 sps:$4 sm:$0xff]   ;;  %v2370_v0 = vld [vmem:[#allocation2 + $0x124] ss:$16 sps:$4 sm:$0xff]  }
 0x1a5   :  { %808 = vperm.xlu1 %2305, %v670_v32   ;;  %813 = vperm.xlu0 %2304, %v671_v33   ;;  %v2372_v21 = vld [vmem:[#allocation2 + $0x12c] ss:$16 sps:$4 sm:$0xff]   ;;  %v2374_v26 = vld [vmem:[#allocation2 + $0x120] ss:$16 sps:$4 sm:$0xff]   ;;  %v2375_v27 = vld [vmem:[#allocation2 + $0x128] ss:$16 sps:$4 sm:$0xff]  }
 0x1a6   :  { %v2382_v32 = vld [vmem:[#allocation2 + $0x164] ss:$16 sps:$4 sm:$0xff]   ;;  %v2384_v33 = vld [vmem:[#allocation2 + $0x16c] ss:$16 sps:$4 sm:$0xff]  }
 0x1a7   :  { %1449 = vmatmul.mubr.bf16.vlgmr.msra.gmra.mrb[32].mxu1 %v2316_v28  ;;  %1674 = vmatmul.mubr.bf16.vlgmr.msra.gmra.mrb[32].mxu0 %v2319_v29  ;;  %v2376_v28 = vld [vmem:[#allocation2 + $0x144] ss:$16 sps:$4 sm:$0xff]   ;;  %v2378_v29 = vld [vmem:[#allocation2 + $0x14c] ss:$16 sps:$4 sm:$0xff]  }
 0x1a8   :  { %1456 = vmatprep.mubr.bf16.mxu1 %v2322_v30  ;;  %1681 = vmatprep.mubr.bf16.mxu0 %v2324_v31  ;;  %v2380_v30 = vld [vmem:[#allocation2 + $0x140] ss:$16 sps:$4 sm:$0xff]   ;;  %v2381_v31 = vld [vmem:[#allocation2 + $0x148] ss:$16 sps:$4 sm:$0xff]  }
 0x1a9   :  { %818 = vperm.xlu1 %2305, %v672_v34   ;;  %823 = vperm.xlu0 %2304, %v673_v35   ;;  %v2386_v34 = vld [vmem:[#allocation2 + $0x160] ss:$16 sps:$4 sm:$0xff]   ;;  %v2387_v35 = vld [vmem:[#allocation2 + $0x168] ss:$16 sps:$4 sm:$0xff]  }
 0x1ad   :  { %828 = vperm.xlu1 %2305, %v674_v40   ;;  %833 = vperm.xlu0 %2304, %v675_v41   ;;  %v2394_v40 = vld [vmem:[#allocation2 + $0x1a4] ss:$16 sps:$4 sm:$0xff]   ;;  %v2396_v41 = vld [vmem:[#allocation2 + $0x1ac] ss:$16 sps:$4 sm:$0xff]  }
 0x1af   :  { %1457 = vmatmul.mubr.bf16.gmra.mrb[36].mxu1 %v2326_v36  ;;  %1682 = vmatmul.mubr.bf16.gmra.mrb[36].mxu0 %v2327_v37  ;;  %v2388_v36 = vld [vmem:[#allocation2 + $0x184] ss:$16 sps:$4 sm:$0xff]   ;;  %v2390_v37 = vld [vmem:[#allocation2 + $0x18c] ss:$16 sps:$4 sm:$0xff]  }
 0x1b0   :  { %1464 = vmatprep.mubr.bf16.mxu1 %v2328_v38  ;;  %1689 = vmatprep.mubr.bf16.mxu0 %v2330_v39  ;;  %v2392_v38 = vld [vmem:[#allocation2 + $0x180] ss:$16 sps:$4 sm:$0xff]   ;;  %v2393_v39 = vld [vmem:[#allocation2 + $0x188] ss:$16 sps:$4 sm:$0xff]  }
 0x1b1   :  { %838 = vperm.xlu1 %2305, %v676_v42   ;;  %843 = vperm.xlu0 %2304, %v677_v43   ;;  %v2398_v42 = vld [vmem:[#allocation2 + $0x1a0] ss:$16 sps:$4 sm:$0xff]   ;;  %v2399_v43 = vld [vmem:[#allocation2 + $0x1a8] ss:$16 sps:$4 sm:$0xff]  }
 0x1b5   :  { %848 = vperm.xlu1 %2305, %v678_v48   ;;  %853 = vperm.xlu0 %2304, %v679_v49   ;;  %v2406_v48 = vld [vmem:[#allocation2 + $0x1e4] ss:$16 sps:$4 sm:$0xff]   ;;  %v2408_v49 = vld [vmem:[#allocation2 + $0x1ec] ss:$16 sps:$4 sm:$0xff]  }
 0x1b7   :  { %1465 = vmatmul.mubr.bf16.gmra.mrb[40].mxu1 %v2332_v44  ;;  %1690 = vmatmul.mubr.bf16.gmra.mrb[40].mxu0 %v2333_v45  ;;  %v2400_v44 = vld [vmem:[#allocation2 + $0x1c4] ss:$16 sps:$4 sm:$0xff]   ;;  %v2402_v45 = vld [vmem:[#allocation2 + $0x1cc] ss:$16 sps:$4 sm:$0xff]  }
 0x1b8   :  { %1472 = vmatprep.mubr.bf16.mxu1 %v2334_v46  ;;  %1697 = vmatprep.mubr.bf16.mxu0 %v2336_v47  ;;  %v2404_v46 = vld [vmem:[#allocation2 + $0x1c0] ss:$16 sps:$4 sm:$0xff]   ;;  %v2405_v47 = vld [vmem:[#allocation2 + $0x1c8] ss:$16 sps:$4 sm:$0xff]  }
 0x1b9   :  { %858 = vperm.xlu1 %2305, %v680_v50   ;;  %863 = vperm.xlu0 %2304, %v681_v51   ;;  %v2410_v50 = vld [vmem:[#allocation2 + $0x1e0] ss:$16 sps:$4 sm:$0xff]   ;;  %v2411_v51 = vld [vmem:[#allocation2 + $0x1e8] ss:$16 sps:$4 sm:$0xff]  }
 0x1bd   :  { %868 = vperm.xlu1 %2305, %v682_v56   ;;  %873 = vperm.xlu0 %2304, %v683_v57   ;;  %v2418_v56 = vld [vmem:[#allocation2 + $0x224] ss:$16 sps:$4 sm:$0xff]   ;;  %v2420_v57 = vld [vmem:[#allocation2 + $0x22c] ss:$16 sps:$4 sm:$0xff]  }
 0x1bf   :  { %1473 = vmatmul.mubr.bf16.gmra.mrb[44].mxu1 %v2338_v52  ;;  %1698 = vmatmul.mubr.bf16.gmra.mrb[44].mxu0 %v2339_v53  ;;  %v2412_v52 = vld [vmem:[#allocation2 + $0x204] ss:$16 sps:$4 sm:$0xff]   ;;  %v2414_v53 = vld [vmem:[#allocation2 + $0x20c] ss:$16 sps:$4 sm:$0xff]  }
 0x1c0   :  { %1480 = vmatprep.mubr.bf16.mxu1 %v2340_v54  ;;  %1705 = vmatprep.mubr.bf16.mxu0 %v2342_v55  ;;  %v2416_v54 = vld [vmem:[#allocation2 + $0x200] ss:$16 sps:$4 sm:$0xff]   ;;  %v2417_v55 = vld [vmem:[#allocation2 + $0x208] ss:$16 sps:$4 sm:$0xff]  }
 0x1c1   :  { %878 = vperm.xlu1 %2305, %v684_v58   ;;  %883 = vperm.xlu0 %2304, %v685_v59   ;;  %v2422_v58 = vld [vmem:[#allocation2 + $0x220] ss:$16 sps:$4 sm:$0xff]   ;;  %v2423_v59 = vld [vmem:[#allocation2 + $0x228] ss:$16 sps:$4 sm:$0xff]  }
 0x1c5   :  { %888 = vperm.xlu1 %2305, %v686_v1   ;;  %893 = vperm.xlu0 %2304, %v687_v2   ;;  %v2430_v1 = vld [vmem:[#allocation2 + $0x264] ss:$16 sps:$4 sm:$0xff]   ;;  %v2432_v2 = vld [vmem:[#allocation2 + $0x26c] ss:$16 sps:$4 sm:$0xff]  }
 0x1c7   :  { %1481 = vmatmul.mubr.bf16.gmra.mrb[48].mxu1 %v2344_v60  ;;  %1706 = vmatmul.mubr.bf16.gmra.mrb[48].mxu0 %v2345_v61  ;;  %v2424_v60 = vld [vmem:[#allocation2 + $0x244] ss:$16 sps:$4 sm:$0xff]   ;;  %v2426_v61 = vld [vmem:[#allocation2 + $0x24c] ss:$16 sps:$4 sm:$0xff]  }
 0x1c8   :  { %1488 = vmatprep.mubr.bf16.mxu1 %v2346_v62  ;;  %1713 = vmatprep.mubr.bf16.mxu0 %v2348_v63  ;;  %v2428_v62 = vld [vmem:[#allocation2 + $0x240] ss:$16 sps:$4 sm:$0xff]   ;;  %v2429_v63 = vld [vmem:[#allocation2 + $0x248] ss:$16 sps:$4 sm:$0xff]  }
 0x1c9   :  { %898 = vperm.xlu1 %2305, %v688_v3   ;;  %903 = vperm.xlu0 %2304, %v689_v4   ;;  %v2434_v3 = vld [vmem:[#allocation2 + $0x260] ss:$16 sps:$4 sm:$0xff]   ;;  %v2435_v4 = vld [vmem:[#allocation2 + $0x268] ss:$16 sps:$4 sm:$0xff]  }
 0x1cd   :  { %908 = vperm.xlu1 %2305, %v690_v9   ;;  %913 = vperm.xlu0 %2304, %v691_v10   ;;  %v2442_v9 = vld [vmem:[#allocation2 + $0x2a4] ss:$16 sps:$4 sm:$0xff]   ;;  %v2444_v10 = vld [vmem:[#allocation2 + $0x2ac] ss:$16 sps:$4 sm:$0xff]  }
 0x1cf   :  { %1489 = vmatmul.mubr.bf16.gmra.mrb[52].mxu1 %v2350_v5  ;;  %1714 = vmatmul.mubr.bf16.gmra.mrb[52].mxu0 %v2351_v6  ;;  %v2436_v5 = vld [vmem:[#allocation2 + $0x284] ss:$16 sps:$4 sm:$0xff]   ;;  %v2438_v6 = vld [vmem:[#allocation2 + $0x28c] ss:$16 sps:$4 sm:$0xff]  }
 0x1d0   :  { %1496 = vmatprep.mubr.bf16.mxu1 %v2352_v7  ;;  %1721 = vmatprep.mubr.bf16.mxu0 %v2354_v8  ;;  %v2440_v7 = vld [vmem:[#allocation2 + $0x280] ss:$16 sps:$4 sm:$0xff]   ;;  %v2441_v8 = vld [vmem:[#allocation2 + $0x288] ss:$16 sps:$4 sm:$0xff]  }
 0x1d1   :  { %918 = vperm.xlu1 %2305, %v692_v11   ;;  %923 = vperm.xlu0 %2304, %v693_v12   ;;  %v2446_v11 = vld [vmem:[#allocation2 + $0x2a0] ss:$16 sps:$4 sm:$0xff]   ;;  %v2447_v12 = vld [vmem:[#allocation2 + $0x2a8] ss:$16 sps:$4 sm:$0xff]  }
 0x1d5   :  { %928 = vperm.xlu1 %2305, %v694_v15   ;;  %933 = vperm.xlu0 %2304, %v695_v16   ;;  %v2454_v15 = vld [vmem:[#allocation2 + $0x2e4] ss:$16 sps:$4 sm:$0xff]   ;;  %v2456_v16 = vld [vmem:[#allocation2 + $0x2ec] ss:$16 sps:$4 sm:$0xff]  }
 0x1d7   :  { %1497 = vmatmul.mubr.bf16.gmra.mrb[56].mxu1 %v2356_v13  ;;  %1722 = vmatmul.mubr.bf16.gmra.mrb[56].mxu0 %v2357_v14  ;;  %v2448_v13 = vld [vmem:[#allocation2 + $0x2c4] ss:$16 sps:$4 sm:$0xff]   ;;  %v2450_v14 = vld [vmem:[#allocation2 + $0x2cc] ss:$16 sps:$4 sm:$0xff]  }
 0x1d8   :  { %1504 = vmatprep.mubr.bf16.mxu1 %v2358_v22  ;;  %1729 = vmatprep.mubr.bf16.mxu0 %v2360_v23  ;;  %v2452_v22 = vld [vmem:[#allocation2 + $0x2c0] ss:$16 sps:$4 sm:$0xff]   ;;  %v2453_v23 = vld [vmem:[#allocation2 + $0x2c8] ss:$16 sps:$4 sm:$0xff]  }
 0x1df   :  { %1505 = vmatmul.mubr.bf16.gmra.mrb[60].mxu1 %v2362_v17  ;;  %1730 = vmatmul.mubr.bf16.gmra.mrb[60].mxu0 %v2363_v24  ;;  %v2458_v17 = vld [vmem:[#allocation2 + $0x2e0] ss:$16 sps:$4 sm:$0xff]   ;;  %v2459_v24 = vld [vmem:[#allocation2 + $0x2e8] ss:$16 sps:$4 sm:$0xff]  }
 0x1e0   :  { %1512 = vmatprep.mubr.bf16.mxu1 %v2364_v18  ;;  %1737 = vmatprep.mubr.bf16.mxu0 %v2366_v25 }
 0x1e7   :  { %1513 = vmatmul.mubr.bf16.gmra.mrb[64].mxu1 %v2368_v19  ;;  %1738 = vmatmul.mubr.bf16.gmra.mrb[64].mxu0 %v2369_v20 }
 0x1e8   :  { %1520 = vmatprep.mubr.bf16.mxu1 %v2370_v0  ;;  %1745 = vmatprep.mubr.bf16.mxu0 %v2372_v21 }
 0x1e9   :  { %v699_v18 = vpop.permute.xlu0 %698  ;;  %v704_v25 = vpop.permute.xlu1 %703 }
 0x1ef   :  { %1521 = vmatmul.mubr.bf16.gmra.mrb[68].mxu1 %v2374_v26  ;;  %1746 = vmatmul.mubr.bf16.gmra.mrb[68].mxu0 %v2375_v27 }
 0x1f0   :  { %1528 = vmatprep.mubr.bf16.mxu1 %v2376_v28  ;;  %1753 = vmatprep.mubr.bf16.mxu0 %v2378_v29 }
 0x1f7   :  { %1529 = vmatmul.mubr.bf16.gmra.mrb[72].mxu1 %v2380_v30  ;;  %1754 = vmatmul.mubr.bf16.gmra.mrb[72].mxu0 %v2381_v31 }
 0x1f8   :  { %1536 = vmatprep.mubr.bf16.mxu1 %v2382_v32  ;;  %1761 = vmatprep.mubr.bf16.mxu0 %v2384_v33 }
 0x1ff   :  { %1537 = vmatmul.mubr.bf16.gmra.mrb[76].mxu1 %v2386_v34  ;;  %1762 = vmatmul.mubr.bf16.gmra.mrb[76].mxu0 %v2387_v35  ;;  %v1914_v35 = vld [vmem:[%s3123_s6] sm:$0xff] }
 0x200   :  { %1544 = vmatprep.mubr.bf16.mxu1 %v2388_v36  ;;  %1769 = vmatprep.mubr.bf16.mxu0 %v2390_v37  ;;  %v1915_v36 = vld [vmem:[%s3123_s6 + $0x8] sm:$0xff] }
 0x207   :  { %1545 = vmatmul.mubr.bf16.gmra.mrb[80].mxu1 %v2392_v38  ;;  %1770 = vmatmul.mubr.bf16.gmra.mrb[80].mxu0 %v2393_v39  ;;  %v709_v38 = vpop.permute.xlu1 %708  ;;  %v714_v39 = vpop.permute.xlu0 %713 }
 0x208   :  { %1552 = vmatprep.mubr.bf16.mxu1 %v2394_v40  ;;  %1777 = vmatprep.mubr.bf16.mxu0 %v2396_v41 }
 0x20f   :  { %1553 = vmatmul.mubr.bf16.gmra.mrb[84].mxu1 %v2398_v42  ;;  %1778 = vmatmul.mubr.bf16.gmra.mrb[84].mxu0 %v2399_v43 }
 0x210   :  { %1560 = vmatprep.mubr.bf16.mxu1 %v2400_v44  ;;  %1785 = vmatprep.mubr.bf16.mxu0 %v2402_v45 }
 0x217   :  { %1561 = vmatmul.mubr.bf16.gmra.mrb[88].mxu1 %v2404_v46  ;;  %1786 = vmatmul.mubr.bf16.gmra.mrb[88].mxu0 %v2405_v47 }
 0x218   :  { %1568 = vmatprep.mubr.bf16.mxu1 %v2406_v48  ;;  %1793 = vmatprep.mubr.bf16.mxu0 %v2408_v49 }
 0x21f   :  { %1569 = vmatmul.mubr.bf16.gmra.mrb[92].mxu1 %v2410_v50  ;;  %1794 = vmatmul.mubr.bf16.gmra.mrb[92].mxu0 %v2411_v51 }
 0x220   :  { %1576 = vmatprep.mubr.bf16.mxu1 %v2412_v52  ;;  %1801 = vmatprep.mubr.bf16.mxu0 %v2414_v53 }
 0x227   :  { %1577 = vmatmul.mubr.bf16.gmra.mrb[96].mxu1 %v2416_v54  ;;  %1802 = vmatmul.mubr.bf16.gmra.mrb[96].mxu0 %v2417_v55  ;;  %v1916_v54 = vld [vmem:[%s3123_s6 + $0x10] sm:$0xff] }
 0x228   :  { %1584 = vmatprep.mubr.bf16.mxu1 %v2418_v56  ;;  %1809 = vmatprep.mubr.bf16.mxu0 %v2420_v57  ;;  %v1917_v57 = vld [vmem:[%s3123_s6 + $0x18] sm:$0xff] }
 0x22f   :  { %1585 = vmatmul.mubr.bf16.gmra.mrb[100].mxu1 %v2422_v58  ;;  %1810 = vmatmul.mubr.bf16.gmra.mrb[100].mxu0 %v2423_v59  ;;  %v719_v59 = vpop.permute.xlu1 %718 }
 0x230   :  { %1592 = vmatprep.mubr.bf16.mxu1 %v2424_v60  ;;  %1817 = vmatprep.mubr.bf16.mxu0 %v2426_v61  ;;  %v724_v61 = vpop.permute.xlu0 %723 }
 0x237   :  { %1593 = vmatmul.mubr.bf16.gmra.mrb[104].mxu1 %v2428_v62  ;;  %1818 = vmatmul.mubr.bf16.gmra.mrb[104].mxu0 %v2429_v63 }
 0x238   :  { %1600 = vmatprep.mubr.bf16.mxu1 %v2430_v1  ;;  %1825 = vmatprep.mubr.bf16.mxu0 %v2432_v2 }
 0x23f   :  { %1601 = vmatmul.mubr.bf16.gmra.mrb[108].mxu1 %v2434_v3  ;;  %1826 = vmatmul.mubr.bf16.gmra.mrb[108].mxu0 %v2435_v4 }
 0x240   :  { %1608 = vmatprep.mubr.bf16.mxu1 %v2436_v5  ;;  %1833 = vmatprep.mubr.bf16.mxu0 %v2438_v6 }
 0x247   :  { %1609 = vmatmul.mubr.bf16.gmra.mrb[112].mxu1 %v2440_v7  ;;  %1834 = vmatmul.mubr.bf16.gmra.mrb[112].mxu0 %v2441_v8 }
 0x248   :  { %1616 = vmatprep.mubr.bf16.mxu1 %v2442_v9  ;;  %1841 = vmatprep.mubr.bf16.mxu0 %v2444_v10 }
 0x24f   :  { %1617 = vmatmul.mubr.bf16.gmra.mrb[116].mxu1 %v2446_v11  ;;  %1842 = vmatmul.mubr.bf16.gmra.mrb[116].mxu0 %v2447_v12 }
 0x250   :  { %1624 = vmatprep.mubr.bf16.mxu1 %v2448_v13  ;;  %1849 = vmatprep.mubr.bf16.mxu0 %v2450_v14  ;;  %v1918_v13 = vld [vmem:[%s3123_s6 + $0x20] sm:$0xff] }
 0x257   :  { %1625 = vmatmul.mubr.bf16.gmra.mrb[120].mxu1 %v2452_v22  ;;  %1850 = vmatmul.mubr.bf16.gmra.mrb[120].mxu0 %v2453_v23  ;;  %v1919_v23 = vld [vmem:[%s3123_s6 + $0x28] sm:$0xff] }
 0x258   :  { %1632 = vmatprep.mubr.bf16.mxu1 %v2454_v15  ;;  %1857 = vmatprep.mubr.bf16.mxu0 %v2456_v16  ;;  %v729_v15 = vpop.permute.xlu1 %728  ;;  %v734_v16 = vpop.permute.xlu0 %733 }
 0x25f   :  { %1633 = vmatmul.mubr.bf16.gmra.mrb[124].mxu1 %v2458_v17  ;;  %1858 = vmatmul.mubr.bf16.gmra.mrb[124].mxu0 %v2459_v24 }
 0x27a   :  { %v1450_v19 = vpop.f32.mrb[32].mxu1  ;;  %v1675_v20 = vpop.f32.mrb[32].mxu0 }
 0x27b   :  { %v1451_v0 = vadd.f32 %v1450_v19, %v699_v18  ;;  %v1452_v21 = vpop.f32.mrb[33].mxu1  ;;  %v1677_v26 = vpop.f32.mrb[33].mxu0 }
 0x27c   :  { %v1453_v27 = vpop.f32.mrb[34].mxu1  ;;  %v1678_v28 = vpop.f32.mrb[34].mxu0 }
 0x27d   :  { %v1676_v29 = vadd.f32 %v1675_v20, %v1451_v0  ;;  %v1454_v30 = vadd.f32 %v1453_v27, %v704_v25  ;;  %v1455_v31 = vpop.f32.mrb[35].mxu1  ;;  %v1680_v32 = vpop.f32.mrb[35].mxu0 }
 0x27f   :  { %v1866_v33 = vmax.f32 %v1676_v29, 0.0  ;;  %v1679_v34 = vadd.f32 %v1678_v28, %v1454_v30 }
 0x281   :  { %v1867_v37 = vmax.f32 %v1679_v34, 0.0  ;;  %v1962_v42 = vmul.f32 %v1914_v35, %v1866_v33  ;;  %v1920_v34 = vld [vmem:[%s3123_s6 + $0x30] sm:$0xff] }
 0x282   :  { %v1458_v40 = vpop.f32.mrb[36].mxu1  ;;  %v1683_v41 = vpop.f32.mrb[36].mxu0 }
 0x283   :  { %v1963_v43 = vmul.f32 %v1915_v36, %v1867_v37  ;;  %v1459_v44 = vadd.f32 %v1458_v40, %v709_v38  ;;  %v1460_v45 = vpop.f32.mrb[37].mxu1  ;;  %v1685_v46 = vpop.f32.mrb[37].mxu0  ;;  %v1921_v37 = vld [vmem:[%s3123_s6 + $0x38] sm:$0xff] }
 0x284   :  { %v1461_v47 = vpop.f32.mrb[38].mxu1  ;;  %v1686_v48 = vpop.f32.mrb[38].mxu0 }
 0x285   :  { %v2010_v49 = vadd.f32 %v1963_v43, %v1962_v42  ;;  %v1684_v50 = vadd.f32 %v1683_v41, %v1459_v44  ;;  %v1462_v51 = vadd.f32 %v1461_v47, %v714_v39  ;;  %v1463_v52 = vpop.f32.mrb[39].mxu1  ;;  %v1688_v53 = vpop.f32.mrb[39].mxu0 }
 0x286   :  { %v739_v38 = vpop.permute.xlu1 %738  ;;  %v744_v39 = vpop.permute.xlu0 %743 }
 0x287   :  { %v1868_v55 = vmax.f32 %v1684_v50, 0.0  ;;  %v1687_v56 = vadd.f32 %v1686_v48, %v1462_v51 }
 0x289   :  { %v1964_v58 = vmul.f32 %v1916_v54, %v1868_v55  ;;  %v1869_v60 = vmax.f32 %v1687_v56, 0.0  ;;  %v1922_v56 = vld [vmem:[%s3123_s6 + $0x40] sm:$0xff] }
 0x28a   :  { %v1466_v62 = vpop.f32.mrb[40].mxu1  ;;  %v1691_v63 = vpop.f32.mrb[40].mxu0 }
 0x28b   :  { %v2011_v1 = vadd.f32 %v2010_v49, %v1964_v58  ;;  %v1965_v2 = vmul.f32 %v1917_v57, %v1869_v60  ;;  %v1467_v3 = vadd.f32 %v1466_v62, %v719_v59  ;;  %v1468_v4 = vpop.f32.mrb[41].mxu1  ;;  %v1693_v5 = vpop.f32.mrb[41].mxu0  ;;  %v1923_v59 = vld [vmem:[%s3123_s6 + $0x48] sm:$0xff] }
 0x28c   :  { %v1469_v6 = vpop.f32.mrb[42].mxu1  ;;  %v1694_v7 = vpop.f32.mrb[42].mxu0 }
 0x28d   :  { %v2012_v8 = vadd.f32 %v2011_v1, %v1965_v2  ;;  %v1692_v9 = vadd.f32 %v1691_v63, %v1467_v3  ;;  %v1470_v10 = vadd.f32 %v1469_v6, %v724_v61  ;;  %v1471_v11 = vpop.f32.mrb[43].mxu1  ;;  %v1696_v12 = vpop.f32.mrb[43].mxu0 }
 0x28e   :  { %v749_v60 = vpop.permute.xlu1 %748  ;;  %v754_v61 = vpop.permute.xlu0 %753 }
 0x28f   :  { %v1870_v14 = vmax.f32 %v1692_v9, 0.0  ;;  %v1695_v22 = vadd.f32 %v1694_v7, %v1470_v10 }
 0x291   :  { %v1966_v17 = vmul.f32 %v1918_v13, %v1870_v14  ;;  %v1871_v24 = vmax.f32 %v1695_v22, 0.0  ;;  %v1924_v22 = vld [vmem:[%s3123_s6 + $0x50] sm:$0xff] }
 0x292   :  { %v1474_v18 = vpop.f32.mrb[44].mxu1  ;;  %v1699_v25 = vpop.f32.mrb[44].mxu0 }
 0x293   :  { %v2013_v19 = vadd.f32 %v2012_v8, %v1966_v17  ;;  %v1967_v20 = vmul.f32 %v1919_v23, %v1871_v24  ;;  %v1475_v0 = vadd.f32 %v1474_v18, %v729_v15  ;;  %v1476_v21 = vpop.f32.mrb[45].mxu1  ;;  %v1701_v26 = vpop.f32.mrb[45].mxu0 }
 0x294   :  { %v1477_v27 = vpop.f32.mrb[46].mxu1  ;;  %v1702_v28 = vpop.f32.mrb[46].mxu0 }
 0x295   :  { %v2014_v29 = vadd.f32 %v2013_v19, %v1967_v20  ;;  %v1700_v30 = vadd.f32 %v1699_v25, %v1475_v0  ;;  %v1478_v31 = vadd.f32 %v1477_v27, %v734_v16  ;;  %v1479_v32 = vpop.f32.mrb[47].mxu1  ;;  %v1704_v33 = vpop.f32.mrb[47].mxu0  ;;  %v1925_v16 = vld [vmem:[%s3123_s6 + $0x58] sm:$0xff] }
 0x296   :  { %v759_v17 = vpop.permute.xlu1 %758  ;;  %v764_v24 = vpop.permute.xlu0 %763 }
 0x297   :  { %v1872_v35 = vmax.f32 %v1700_v30, 0.0  ;;  %v1703_v36 = vadd.f32 %v1702_v28, %v1478_v31 }
 0x299   :  { %v1968_v40 = vmul.f32 %v1920_v34, %v1872_v35  ;;  %v1873_v41 = vmax.f32 %v1703_v36, 0.0  ;;  %v1926_v36 = vld [vmem:[%s3123_s6 + $0x60] sm:$0xff] }
 0x29a   :  { %v1482_v42 = vpop.f32.mrb[48].mxu1  ;;  %v1707_v43 = vpop.f32.mrb[48].mxu0 }
 0x29b   :  { %v2015_v44 = vadd.f32 %v2014_v29, %v1968_v40  ;;  %v1969_v45 = vmul.f32 %v1921_v37, %v1873_v41  ;;  %v1483_v46 = vadd.f32 %v1482_v42, %v739_v38  ;;  %v1484_v47 = vpop.f32.mrb[49].mxu1  ;;  %v1709_v48 = vpop.f32.mrb[49].mxu0 }
 0x29c   :  { %v1485_v49 = vpop.f32.mrb[50].mxu1  ;;  %v1710_v50 = vpop.f32.mrb[50].mxu0 }
 0x29d   :  { %v2016_v51 = vadd.f32 %v2015_v44, %v1969_v45  ;;  %v1708_v52 = vadd.f32 %v1707_v43, %v1483_v46  ;;  %v1486_v53 = vadd.f32 %v1485_v49, %v744_v39  ;;  %v1487_v54 = vpop.f32.mrb[51].mxu1  ;;  %v1712_v55 = vpop.f32.mrb[51].mxu0  ;;  %v1927_v39 = vld [vmem:[%s3123_s6 + $0x68] sm:$0xff] }
 0x29e   :  { %v769_v40 = vpop.permute.xlu1 %768  ;;  %v774_v41 = vpop.permute.xlu0 %773 }
 0x29f   :  { %v1874_v57 = vmax.f32 %v1708_v52, 0.0  ;;  %v1711_v58 = vadd.f32 %v1710_v50, %v1486_v53 }
 0x2a1   :  { %v1970_v62 = vmul.f32 %v1922_v56, %v1874_v57  ;;  %v1875_v63 = vmax.f32 %v1711_v58, 0.0  ;;  %v1928_v58 = vld [vmem:[%s3123_s6 + $0x70] sm:$0xff] }
 0x2a2   :  { %v1490_v1 = vpop.f32.mrb[52].mxu1  ;;  %v1715_v2 = vpop.f32.mrb[52].mxu0 }
 0x2a3   :  { %v2017_v3 = vadd.f32 %v2016_v51, %v1970_v62  ;;  %v1971_v4 = vmul.f32 %v1923_v59, %v1875_v63  ;;  %v1491_v5 = vadd.f32 %v1490_v1, %v749_v60  ;;  %v1492_v6 = vpop.f32.mrb[53].mxu1  ;;  %v1717_v7 = vpop.f32.mrb[53].mxu0 }
 0x2a4   :  { %v1493_v8 = vpop.f32.mrb[54].mxu1  ;;  %v1718_v9 = vpop.f32.mrb[54].mxu0 }
 0x2a5   :  { %v2018_v10 = vadd.f32 %v2017_v3, %v1971_v4  ;;  %v1716_v11 = vadd.f32 %v1715_v2, %v1491_v5  ;;  %v1494_v12 = vadd.f32 %v1493_v8, %v754_v61  ;;  %v1495_v13 = vpop.f32.mrb[55].mxu1  ;;  %v1720_v14 = vpop.f32.mrb[55].mxu0  ;;  %v1929_v61 = vld [vmem:[%s3123_s6 + $0x78] sm:$0xff] }
 0x2a6   :  { %v779_v62 = vpop.permute.xlu1 %778  ;;  %v784_v63 = vpop.permute.xlu0 %783 }
 0x2a7   :  { %v1876_v23 = vmax.f32 %v1716_v11, 0.0  ;;  %v1719_v15 = vadd.f32 %v1718_v9, %v1494_v12 }
 0x2a9   :  { %v1972_v18 = vmul.f32 %v1924_v22, %v1876_v23  ;;  %v1877_v25 = vmax.f32 %v1719_v15, 0.0  ;;  %v1930_v15 = vld [vmem:[%s3123_s6 + $0x80] sm:$0xff] }
 0x2aa   :  { %v1498_v19 = vpop.f32.mrb[56].mxu1  ;;  %v1723_v20 = vpop.f32.mrb[56].mxu0 }
 0x2ab   :  { %v2019_v0 = vadd.f32 %v2018_v10, %v1972_v18  ;;  %v1973_v21 = vmul.f32 %v1925_v16, %v1877_v25  ;;  %v1499_v26 = vadd.f32 %v1498_v19, %v759_v17  ;;  %v1500_v27 = vpop.f32.mrb[57].mxu1  ;;  %v1725_v28 = vpop.f32.mrb[57].mxu0 }
 0x2ac   :  { %v1501_v29 = vpop.f32.mrb[58].mxu1  ;;  %v1726_v30 = vpop.f32.mrb[58].mxu0 }
 0x2ad   :  { %v2020_v31 = vadd.f32 %v2019_v0, %v1973_v21  ;;  %v1724_v32 = vadd.f32 %v1723_v20, %v1499_v26  ;;  %v1502_v33 = vadd.f32 %v1501_v29, %v764_v24  ;;  %v1503_v34 = vpop.f32.mrb[59].mxu1  ;;  %v1728_v35 = vpop.f32.mrb[59].mxu0  ;;  %v1931_v24 = vld [vmem:[%s3123_s6 + $0x88] sm:$0xff] }
 0x2ae   :  { %v789_v18 = vpop.permute.xlu1 %788  ;;  %v794_v25 = vpop.permute.xlu0 %793 }
 0x2af   :  { %v1878_v37 = vmax.f32 %v1724_v32, 0.0  ;;  %v1727_v38 = vadd.f32 %v1726_v30, %v1502_v33 }
 0x2b1   :  { %v1974_v42 = vmul.f32 %v1926_v36, %v1878_v37  ;;  %v1879_v43 = vmax.f32 %v1727_v38, 0.0  ;;  %v1932_v38 = vld [vmem:[%s3123_s6 + $0x90] sm:$0xff] }
 0x2b2   :  { %v1506_v44 = vpop.f32.mrb[60].mxu1  ;;  %v1731_v45 = vpop.f32.mrb[60].mxu0 }
 0x2b3   :  { %v2021_v46 = vadd.f32 %v2020_v31, %v1974_v42  ;;  %v1975_v47 = vmul.f32 %v1927_v39, %v1879_v43  ;;  %v1507_v48 = vadd.f32 %v1506_v44, %v769_v40  ;;  %v1508_v49 = vpop.f32.mrb[61].mxu1  ;;  %v1733_v50 = vpop.f32.mrb[61].mxu0 }
 0x2b4   :  { %v1509_v51 = vpop.f32.mrb[62].mxu1  ;;  %v1734_v52 = vpop.f32.mrb[62].mxu0 }
 0x2b5   :  { %v2022_v53 = vadd.f32 %v2021_v46, %v1975_v47  ;;  %v1732_v54 = vadd.f32 %v1731_v45, %v1507_v48  ;;  %v1510_v55 = vadd.f32 %v1509_v51, %v774_v41  ;;  %v1511_v56 = vpop.f32.mrb[63].mxu1  ;;  %v1736_v57 = vpop.f32.mrb[63].mxu0  ;;  %v1933_v41 = vld [vmem:[%s3123_s6 + $0x98] sm:$0xff] }
 0x2b6   :  { %v799_v42 = vpop.permute.xlu1 %798  ;;  %v804_v43 = vpop.permute.xlu0 %803 }
 0x2b7   :  { %v1880_v59 = vmax.f32 %v1732_v54, 0.0  ;;  %v1735_v60 = vadd.f32 %v1734_v52, %v1510_v55 }
 0x2b9   :  { %v1976_v1 = vmul.f32 %v1928_v58, %v1880_v59  ;;  %v1881_v2 = vmax.f32 %v1735_v60, 0.0  ;;  %v1934_v60 = vld [vmem:[%s3123_s6 + $0xa0] sm:$0xff] }
 0x2ba   :  { %v1514_v3 = vpop.f32.mrb[64].mxu1  ;;  %v1739_v4 = vpop.f32.mrb[64].mxu0 }
 0x2bb   :  { %v2023_v5 = vadd.f32 %v2022_v53, %v1976_v1  ;;  %v1977_v6 = vmul.f32 %v1929_v61, %v1881_v2  ;;  %v1515_v7 = vadd.f32 %v1514_v3, %v779_v62  ;;  %v1516_v8 = vpop.f32.mrb[65].mxu1  ;;  %v1741_v9 = vpop.f32.mrb[65].mxu0 }
 0x2bc   :  { %v1517_v10 = vpop.f32.mrb[66].mxu1  ;;  %v1742_v11 = vpop.f32.mrb[66].mxu0 }
 0x2bd   :  { %v2024_v12 = vadd.f32 %v2023_v5, %v1977_v6  ;;  %v1740_v13 = vadd.f32 %v1739_v4, %v1515_v7  ;;  %v1518_v14 = vadd.f32 %v1517_v10, %v784_v63  ;;  %v1519_v22 = vpop.f32.mrb[67].mxu1  ;;  %v1744_v23 = vpop.f32.mrb[67].mxu0  ;;  %v1935_v63 = vld [vmem:[%s3123_s6 + $0xa8] sm:$0xff] }
 0x2be   :  { %v809_v1 = vpop.permute.xlu1 %808  ;;  %v814_v2 = vpop.permute.xlu0 %813 }
 0x2bf   :  { %v1882_v16 = vmax.f32 %v1740_v13, 0.0  ;;  %v1743_v17 = vadd.f32 %v1742_v11, %v1518_v14 }
 0x2c1   :  { %v1978_v19 = vmul.f32 %v1930_v15, %v1882_v16  ;;  %v1883_v20 = vmax.f32 %v1743_v17, 0.0  ;;  %v1936_v17 = vld [vmem:[%s3123_s6 + $0xb0] sm:$0xff] }
 0x2c2   :  { %v1522_v0 = vpop.f32.mrb[68].mxu1  ;;  %v1747_v21 = vpop.f32.mrb[68].mxu0 }
 0x2c3   :  { %v2025_v26 = vadd.f32 %v2024_v12, %v1978_v19  ;;  %v1979_v27 = vmul.f32 %v1931_v24, %v1883_v20  ;;  %v1523_v28 = vadd.f32 %v1522_v0, %v789_v18  ;;  %v1524_v29 = vpop.f32.mrb[69].mxu1  ;;  %v1749_v30 = vpop.f32.mrb[69].mxu0 }
 0x2c4   :  { %v1525_v31 = vpop.f32.mrb[70].mxu1  ;;  %v1750_v32 = vpop.f32.mrb[70].mxu0 }
 0x2c5   :  { %v2026_v33 = vadd.f32 %v2025_v26, %v1979_v27  ;;  %v1748_v34 = vadd.f32 %v1747_v21, %v1523_v28  ;;  %v1526_v35 = vadd.f32 %v1525_v31, %v794_v25  ;;  %v1527_v36 = vpop.f32.mrb[71].mxu1  ;;  %v1752_v37 = vpop.f32.mrb[71].mxu0  ;;  %v1937_v25 = vld [vmem:[%s3123_s6 + $0xb8] sm:$0xff] }
 0x2c6   :  { %v819_v19 = vpop.permute.xlu1 %818  ;;  %v824_v20 = vpop.permute.xlu0 %823 }
 0x2c7   :  { %v1884_v39 = vmax.f32 %v1748_v34, 0.0  ;;  %v1751_v40 = vadd.f32 %v1750_v32, %v1526_v35 }
 0x2c9   :  { %v1980_v44 = vmul.f32 %v1932_v38, %v1884_v39  ;;  %v1885_v45 = vmax.f32 %v1751_v40, 0.0  ;;  %v1938_v40 = vld [vmem:[%s3123_s6 + $0xc0] sm:$0xff] }
 0x2ca   :  { %v1530_v46 = vpop.f32.mrb[72].mxu1  ;;  %v1755_v47 = vpop.f32.mrb[72].mxu0 }
 0x2cb   :  { %v2027_v48 = vadd.f32 %v2026_v33, %v1980_v44  ;;  %v1981_v49 = vmul.f32 %v1933_v41, %v1885_v45  ;;  %v1531_v50 = vadd.f32 %v1530_v46, %v799_v42  ;;  %v1532_v51 = vpop.f32.mrb[73].mxu1  ;;  %v1757_v52 = vpop.f32.mrb[73].mxu0 }
 0x2cc   :  { %v1533_v53 = vpop.f32.mrb[74].mxu1  ;;  %v1758_v54 = vpop.f32.mrb[74].mxu0 }
 0x2cd   :  { %v2028_v55 = vadd.f32 %v2027_v48, %v1981_v49  ;;  %v1756_v56 = vadd.f32 %v1755_v47, %v1531_v50  ;;  %v1534_v57 = vadd.f32 %v1533_v53, %v804_v43  ;;  %v1535_v58 = vpop.f32.mrb[75].mxu1  ;;  %v1760_v59 = vpop.f32.mrb[75].mxu0  ;;  %v1939_v43 = vld [vmem:[%s3123_s6 + $0xc8] sm:$0xff] }
 0x2ce   :  { %v829_v44 = vpop.permute.xlu1 %828  ;;  %v834_v45 = vpop.permute.xlu0 %833 }
 0x2cf   :  { %v1886_v61 = vmax.f32 %v1756_v56, 0.0  ;;  %v1759_v62 = vadd.f32 %v1758_v54, %v1534_v57 }
 0x2d1   :  { %v1982_v3 = vmul.f32 %v1934_v60, %v1886_v61  ;;  %v1887_v4 = vmax.f32 %v1759_v62, 0.0  ;;  %v1940_v62 = vld [vmem:[%s3123_s6 + $0xd0] sm:$0xff] }
 0x2d2   :  { %v1538_v5 = vpop.f32.mrb[76].mxu1  ;;  %v1763_v6 = vpop.f32.mrb[76].mxu0 }
 0x2d3   :  { %v2029_v7 = vadd.f32 %v2028_v55, %v1982_v3  ;;  %v1983_v8 = vmul.f32 %v1935_v63, %v1887_v4  ;;  %v1539_v9 = vadd.f32 %v1538_v5, %v809_v1  ;;  %v1540_v10 = vpop.f32.mrb[77].mxu1  ;;  %v1765_v11 = vpop.f32.mrb[77].mxu0 }
 0x2d4   :  { %v1541_v12 = vpop.f32.mrb[78].mxu1  ;;  %v1766_v13 = vpop.f32.mrb[78].mxu0 }
 0x2d5   :  { %v2030_v14 = vadd.f32 %v2029_v7, %v1983_v8  ;;  %v1764_v22 = vadd.f32 %v1763_v6, %v1539_v9  ;;  %v1542_v23 = vadd.f32 %v1541_v12, %v814_v2  ;;  %v1543_v15 = vpop.f32.mrb[79].mxu1  ;;  %v1768_v16 = vpop.f32.mrb[79].mxu0  ;;  %v1941_v2 = vld [vmem:[%s3123_s6 + $0xd8] sm:$0xff] }
 0x2d6   :  { %v839_v3 = vpop.permute.xlu1 %838  ;;  %v844_v4 = vpop.permute.xlu0 %843 }
 0x2d7   :  { %v1888_v24 = vmax.f32 %v1764_v22, 0.0  ;;  %v1767_v18 = vadd.f32 %v1766_v13, %v1542_v23 }
 0x2d9   :  { %v1984_v0 = vmul.f32 %v1936_v17, %v1888_v24  ;;  %v1889_v21 = vmax.f32 %v1767_v18, 0.0  ;;  %v1942_v18 = vld [vmem:[%s3123_s6 + $0xe0] sm:$0xff] }
 0x2da   :  { %v1546_v26 = vpop.f32.mrb[80].mxu1  ;;  %v1771_v27 = vpop.f32.mrb[80].mxu0 }
 0x2db   :  { %v2031_v28 = vadd.f32 %v2030_v14, %v1984_v0  ;;  %v1985_v29 = vmul.f32 %v1937_v25, %v1889_v21  ;;  %v1547_v30 = vadd.f32 %v1546_v26, %v819_v19  ;;  %v1548_v31 = vpop.f32.mrb[81].mxu1  ;;  %v1773_v32 = vpop.f32.mrb[81].mxu0 }
 0x2dc   :  { %v1549_v33 = vpop.f32.mrb[82].mxu1  ;;  %v1774_v34 = vpop.f32.mrb[82].mxu0 }
 0x2dd   :  { %v2032_v35 = vadd.f32 %v2031_v28, %v1985_v29  ;;  %v1772_v36 = vadd.f32 %v1771_v27, %v1547_v30  ;;  %v1550_v37 = vadd.f32 %v1549_v33, %v824_v20  ;;  %v1551_v38 = vpop.f32.mrb[83].mxu1  ;;  %v1776_v39 = vpop.f32.mrb[83].mxu0  ;;  %v1943_v20 = vld [vmem:[%s3123_s6 + $0xe8] sm:$0xff] }
 0x2de   :  { %v849_v0 = vpop.permute.xlu1 %848  ;;  %v854_v21 = vpop.permute.xlu0 %853 }
 0x2df   :  { %v1890_v41 = vmax.f32 %v1772_v36, 0.0  ;;  %v1775_v42 = vadd.f32 %v1774_v34, %v1550_v37 }
 0x2e1   :  { %v1986_v46 = vmul.f32 %v1938_v40, %v1890_v41  ;;  %v1891_v47 = vmax.f32 %v1775_v42, 0.0  ;;  %v1944_v42 = vld [vmem:[%s3123_s6 + $0xf0] sm:$0xff] }
 0x2e2   :  { %v1554_v48 = vpop.f32.mrb[84].mxu1  ;;  %v1779_v49 = vpop.f32.mrb[84].mxu0 }
 0x2e3   :  { %v2033_v50 = vadd.f32 %v2032_v35, %v1986_v46  ;;  %v1987_v51 = vmul.f32 %v1939_v43, %v1891_v47  ;;  %v1555_v52 = vadd.f32 %v1554_v48, %v829_v44  ;;  %v1556_v53 = vpop.f32.mrb[85].mxu1  ;;  %v1781_v54 = vpop.f32.mrb[85].mxu0 }
 0x2e4   :  { %v1557_v55 = vpop.f32.mrb[86].mxu1  ;;  %v1782_v56 = vpop.f32.mrb[86].mxu0 }
 0x2e5   :  { %v2034_v57 = vadd.f32 %v2033_v50, %v1987_v51  ;;  %v1780_v58 = vadd.f32 %v1779_v49, %v1555_v52  ;;  %v1558_v59 = vadd.f32 %v1557_v55, %v834_v45  ;;  %v1559_v60 = vpop.f32.mrb[87].mxu1  ;;  %v1784_v61 = vpop.f32.mrb[87].mxu0  ;;  %v1945_v45 = vld [vmem:[%s3123_s6 + $0xf8] sm:$0xff] }
 0x2e6   :  { %v859_v46 = vpop.permute.xlu1 %858  ;;  %v864_v47 = vpop.permute.xlu0 %863 }
 0x2e7   :  { %v1892_v63 = vmax.f32 %v1780_v58, 0.0  ;;  %v1783_v1 = vadd.f32 %v1782_v56, %v1558_v59 }
 0x2e9   :  { %v1988_v5 = vmul.f32 %v1940_v62, %v1892_v63  ;;  %v1893_v6 = vmax.f32 %v1783_v1, 0.0  ;;  %v1946_v1 = vld [vmem:[%s3123_s6 + $0x100] sm:$0xff] }
 0x2ea   :  { %v1562_v7 = vpop.f32.mrb[88].mxu1  ;;  %v1787_v8 = vpop.f32.mrb[88].mxu0 }
 0x2eb   :  { %v2035_v9 = vadd.f32 %v2034_v57, %v1988_v5  ;;  %v1989_v10 = vmul.f32 %v1941_v2, %v1893_v6  ;;  %v1563_v11 = vadd.f32 %v1562_v7, %v839_v3  ;;  %v1564_v12 = vpop.f32.mrb[89].mxu1  ;;  %v1789_v13 = vpop.f32.mrb[89].mxu0 }
 0x2ec   :  { %v1565_v14 = vpop.f32.mrb[90].mxu1  ;;  %v1790_v22 = vpop.f32.mrb[90].mxu0 }
 0x2ed   :  { %v2036_v23 = vadd.f32 %v2035_v9, %v1989_v10  ;;  %v1788_v15 = vadd.f32 %v1787_v8, %v1563_v11  ;;  %v1566_v16 = vadd.f32 %v1565_v14, %v844_v4  ;;  %v1567_v17 = vpop.f32.mrb[91].mxu1  ;;  %v1792_v24 = vpop.f32.mrb[91].mxu0  ;;  %v1947_v4 = vld [vmem:[%s3123_s6 + $0x108] sm:$0xff] }
 0x2ee   :  { %v869_v5 = vpop.permute.xlu1 %868  ;;  %v874_v6 = vpop.permute.xlu0 %873 }
 0x2ef   :  { %v1894_v25 = vmax.f32 %v1788_v15, 0.0  ;;  %v1791_v19 = vadd.f32 %v1790_v22, %v1566_v16 }
 0x2f1   :  { %v1990_v26 = vmul.f32 %v1942_v18, %v1894_v25  ;;  %v1895_v27 = vmax.f32 %v1791_v19, 0.0  ;;  %v1948_v19 = vld [vmem:[%s3123_s6 + $0x110] sm:$0xff] }
 0x2f2   :  { %v1570_v28 = vpop.f32.mrb[92].mxu1  ;;  %v1795_v29 = vpop.f32.mrb[92].mxu0 }
 0x2f3   :  { %v2037_v30 = vadd.f32 %v2036_v23, %v1990_v26  ;;  %v1991_v31 = vmul.f32 %v1943_v20, %v1895_v27  ;;  %v1571_v32 = vadd.f32 %v1570_v28, %v849_v0  ;;  %v1572_v33 = vpop.f32.mrb[93].mxu1  ;;  %v1797_v34 = vpop.f32.mrb[93].mxu0 }
 0x2f4   :  { %v1573_v35 = vpop.f32.mrb[94].mxu1  ;;  %v1798_v36 = vpop.f32.mrb[94].mxu0 }
 0x2f5   :  { %v2038_v37 = vadd.f32 %v2037_v30, %v1991_v31  ;;  %v1796_v38 = vadd.f32 %v1795_v29, %v1571_v32  ;;  %v1574_v39 = vadd.f32 %v1573_v35, %v854_v21  ;;  %v1575_v40 = vpop.f32.mrb[95].mxu1  ;;  %v1800_v41 = vpop.f32.mrb[95].mxu0  ;;  %v1949_v21 = vld [vmem:[%s3123_s6 + $0x118] sm:$0xff] }
 0x2f6   :  { %v879_v26 = vpop.permute.xlu1 %878  ;;  %v884_v27 = vpop.permute.xlu0 %883 }
 0x2f7   :  { %v1896_v43 = vmax.f32 %v1796_v38, 0.0  ;;  %v1799_v44 = vadd.f32 %v1798_v36, %v1574_v39 }
 0x2f9   :  { %v1992_v48 = vmul.f32 %v1944_v42, %v1896_v43  ;;  %v1897_v49 = vmax.f32 %v1799_v44, 0.0  ;;  %v1950_v44 = vld [vmem:[%s3123_s6 + $0x120] sm:$0xff] }
 0x2fa   :  { %v1578_v50 = vpop.f32.mrb[96].mxu1  ;;  %v1803_v51 = vpop.f32.mrb[96].mxu0 }
 0x2fb   :  { %v2039_v52 = vadd.f32 %v2038_v37, %v1992_v48  ;;  %v1993_v53 = vmul.f32 %v1945_v45, %v1897_v49  ;;  %v1579_v54 = vadd.f32 %v1578_v50, %v859_v46  ;;  %v1580_v55 = vpop.f32.mrb[97].mxu1  ;;  %v1805_v56 = vpop.f32.mrb[97].mxu0 }
 0x2fc   :  { %v1581_v57 = vpop.f32.mrb[98].mxu1  ;;  %v1806_v58 = vpop.f32.mrb[98].mxu0 }
 0x2fd   :  { %v2040_v59 = vadd.f32 %v2039_v52, %v1993_v53  ;;  %v1804_v60 = vadd.f32 %v1803_v51, %v1579_v54  ;;  %v1582_v61 = vadd.f32 %v1581_v57, %v864_v47  ;;  %v1583_v62 = vpop.f32.mrb[99].mxu1  ;;  %v1808_v63 = vpop.f32.mrb[99].mxu0  ;;  %v1951_v47 = vld [vmem:[%s3123_s6 + $0x128] sm:$0xff] }
 0x2fe   :  { %v889_v48 = vpop.permute.xlu1 %888  ;;  %v894_v49 = vpop.permute.xlu0 %893 }
 0x2ff   :  { %v1898_v2 = vmax.f32 %v1804_v60, 0.0  ;;  %v1807_v3 = vadd.f32 %v1806_v58, %v1582_v61 }
 0x301   :  { %v1994_v7 = vmul.f32 %v1946_v1, %v1898_v2  ;;  %v1899_v8 = vmax.f32 %v1807_v3, 0.0  ;;  %v1952_v3 = vld [vmem:[%s3123_s6 + $0x130] sm:$0xff] }
 0x302   :  { %v1586_v9 = vpop.f32.mrb[100].mxu1  ;;  %v1811_v10 = vpop.f32.mrb[100].mxu0 }
 0x303   :  { %v2041_v11 = vadd.f32 %v2040_v59, %v1994_v7  ;;  %v1995_v12 = vmul.f32 %v1947_v4, %v1899_v8  ;;  %v1587_v13 = vadd.f32 %v1586_v9, %v869_v5  ;;  %v1588_v14 = vpop.f32.mrb[101].mxu1  ;;  %v1813_v22 = vpop.f32.mrb[101].mxu0 }
 0x304   :  { %v1589_v23 = vpop.f32.mrb[102].mxu1  ;;  %v1814_v15 = vpop.f32.mrb[102].mxu0 }
 0x305   :  { %v2042_v16 = vadd.f32 %v2041_v11, %v1995_v12  ;;  %v1812_v17 = vadd.f32 %v1811_v10, %v1587_v13  ;;  %v1590_v24 = vadd.f32 %v1589_v23, %v874_v6  ;;  %v1591_v18 = vpop.f32.mrb[103].mxu1  ;;  %v1816_v25 = vpop.f32.mrb[103].mxu0  ;;  %v1953_v6 = vld [vmem:[%s3123_s6 + $0x138] sm:$0xff] }
 0x306   :  { %v899_v7 = vpop.permute.xlu1 %898  ;;  %v904_v8 = vpop.permute.xlu0 %903 }
 0x307   :  { %v1900_v20 = vmax.f32 %v1812_v17, 0.0  ;;  %v1815_v0 = vadd.f32 %v1814_v15, %v1590_v24 }
 0x309   :  { %v1996_v28 = vmul.f32 %v1948_v19, %v1900_v20  ;;  %v1901_v29 = vmax.f32 %v1815_v0, 0.0  ;;  %v1954_v0 = vld [vmem:[%s3123_s6 + $0x140] sm:$0xff] }
 0x30a   :  { %v1594_v30 = vpop.f32.mrb[104].mxu1  ;;  %v1819_v31 = vpop.f32.mrb[104].mxu0 }
 0x30b   :  { %v2043_v32 = vadd.f32 %v2042_v16, %v1996_v28  ;;  %v1997_v33 = vmul.f32 %v1949_v21, %v1901_v29  ;;  %v1595_v34 = vadd.f32 %v1594_v30, %v879_v26  ;;  %v1596_v35 = vpop.f32.mrb[105].mxu1  ;;  %v1821_v36 = vpop.f32.mrb[105].mxu0 }
 0x30c   :  { %v1597_v37 = vpop.f32.mrb[106].mxu1  ;;  %v1822_v38 = vpop.f32.mrb[106].mxu0 }
 0x30d   :  { %v2044_v39 = vadd.f32 %v2043_v32, %v1997_v33  ;;  %v1820_v40 = vadd.f32 %v1819_v31, %v1595_v34  ;;  %v1598_v41 = vadd.f32 %v1597_v37, %v884_v27  ;;  %v1599_v42 = vpop.f32.mrb[107].mxu1  ;;  %v1824_v43 = vpop.f32.mrb[107].mxu0  ;;  %v1955_v27 = vld [vmem:[%s3123_s6 + $0x148] sm:$0xff] }
 0x30e   :  { %v909_v28 = vpop.permute.xlu1 %908  ;;  %v914_v29 = vpop.permute.xlu0 %913 }
 0x30f   :  { %v1902_v45 = vmax.f32 %v1820_v40, 0.0  ;;  %v1823_v46 = vadd.f32 %v1822_v38, %v1598_v41 }
 0x311   :  { %v1998_v50 = vmul.f32 %v1950_v44, %v1902_v45  ;;  %v1903_v51 = vmax.f32 %v1823_v46, 0.0  ;;  %v1956_v46 = vld [vmem:[%s3123_s6 + $0x150] sm:$0xff] }
 0x312   :  { %v1602_v52 = vpop.f32.mrb[108].mxu1  ;;  %v1827_v53 = vpop.f32.mrb[108].mxu0 }
 0x313   :  { %v2045_v54 = vadd.f32 %v2044_v39, %v1998_v50  ;;  %v1999_v55 = vmul.f32 %v1951_v47, %v1903_v51  ;;  %v1603_v56 = vadd.f32 %v1602_v52, %v889_v48  ;;  %v1604_v57 = vpop.f32.mrb[109].mxu1  ;;  %v1829_v58 = vpop.f32.mrb[109].mxu0 }
 0x314   :  { %v1605_v59 = vpop.f32.mrb[110].mxu1  ;;  %v1830_v60 = vpop.f32.mrb[110].mxu0 }
 0x315   :  { %v2046_v61 = vadd.f32 %v2045_v54, %v1999_v55  ;;  %v1828_v62 = vadd.f32 %v1827_v53, %v1603_v56  ;;  %v1606_v63 = vadd.f32 %v1605_v59, %v894_v49  ;;  %v1607_v1 = vpop.f32.mrb[111].mxu1  ;;  %v1832_v2 = vpop.f32.mrb[111].mxu0  ;;  %v1957_v49 = vld [vmem:[%s3123_s6 + $0x158] sm:$0xff] }
 0x316   :  { %v919_v50 = vpop.permute.xlu1 %918  ;;  %v924_v51 = vpop.permute.xlu0 %923 }
 0x317   :  { %v1904_v4 = vmax.f32 %v1828_v62, 0.0  ;;  %v1831_v5 = vadd.f32 %v1830_v60, %v1606_v63 }
 0x319   :  { %v2000_v9 = vmul.f32 %v1952_v3, %v1904_v4  ;;  %v1905_v10 = vmax.f32 %v1831_v5, 0.0  ;;  %v1958_v5 = vld [vmem:[%s3123_s6 + $0x160] sm:$0xff] }
 0x31a   :  { %v1610_v11 = vpop.f32.mrb[112].mxu1  ;;  %v1835_v12 = vpop.f32.mrb[112].mxu0 }
 0x31b   :  { %v2047_v13 = vadd.f32 %v2046_v61, %v2000_v9  ;;  %v2001_v14 = vmul.f32 %v1953_v6, %v1905_v10  ;;  %v1611_v22 = vadd.f32 %v1610_v11, %v899_v7  ;;  %v1612_v23 = vpop.f32.mrb[113].mxu1  ;;  %v1837_v15 = vpop.f32.mrb[113].mxu0 }
 0x31c   :  { %v1613_v16 = vpop.f32.mrb[114].mxu1  ;;  %v1838_v17 = vpop.f32.mrb[114].mxu0 }
 0x31d   :  { %v2048_v24 = vadd.f32 %v2047_v13, %v2001_v14  ;;  %v1836_v18 = vadd.f32 %v1835_v12, %v1611_v22  ;;  %v1614_v25 = vadd.f32 %v1613_v16, %v904_v8  ;;  %v1615_v19 = vpop.f32.mrb[115].mxu1  ;;  %v1840_v20 = vpop.f32.mrb[115].mxu0  ;;  %v1959_v8 = vld [vmem:[%s3123_s6 + $0x168] sm:$0xff] }
 0x31e   :  { %v929_v9 = vpop.permute.xlu1 %928  ;;  %v934_v10 = vpop.permute.xlu0 %933 }
 0x31f   :  { %v1906_v21 = vmax.f32 %v1836_v18, 0.0  ;;  %v1839_v26 = vadd.f32 %v1838_v17, %v1614_v25 }
 0x321   :  { %v2002_v30 = vmul.f32 %v1954_v0, %v1906_v21  ;;  %v1907_v31 = vmax.f32 %v1839_v26, 0.0  ;;  %v1960_v26 = vld [vmem:[%s3123_s6 + $0x170] sm:$0xff] }
 0x322   :  { %v1618_v32 = vpop.f32.mrb[116].mxu1  ;;  %v1843_v33 = vpop.f32.mrb[116].mxu0 }
 0x323   :  { %v2049_v34 = vadd.f32 %v2048_v24, %v2002_v30  ;;  %v2003_v35 = vmul.f32 %v1955_v27, %v1907_v31  ;;  %v1619_v36 = vadd.f32 %v1618_v32, %v909_v28  ;;  %v1620_v37 = vpop.f32.mrb[117].mxu1  ;;  %v1845_v38 = vpop.f32.mrb[117].mxu0 }
 0x324   :  { %v1621_v39 = vpop.f32.mrb[118].mxu1  ;;  %v1846_v40 = vpop.f32.mrb[118].mxu0 }
 0x325   :  { %v2050_v41 = vadd.f32 %v2049_v34, %v2003_v35  ;;  %v1844_v42 = vadd.f32 %v1843_v33, %v1619_v36  ;;  %v1622_v43 = vadd.f32 %v1621_v39, %v914_v29  ;;  %v1623_v44 = vpop.f32.mrb[119].mxu1  ;;  %v1848_v45 = vpop.f32.mrb[119].mxu0  ;;  %v1961_v29 = vld [vmem:[%s3123_s6 + $0x178] sm:$0xff]  ;;  %s2482_s6 = scalar_lea.vmem %s2073_s24, 16 }
 0x326   :  { %p2483_p8 = scmp.ne.s32.totalorder %s2073_s24, %s2482_s6  ;;  %p2488_p10 = scmp.lt.s32.totalorder %s2486_s25, %s2482_s6 }
 0x327   :  { %v1908_v47 = vmax.f32 %v1844_v42, 0.0  ;;  %v1847_v48 = vadd.f32 %v1846_v40, %v1622_v43  ;;  %v2063_v40 = vld [vmem:[%s3124_s7] sm:$0x1] }
 0x328   :  { %p2489_p11 = por %p2488_p10, %p2487_p9 }
 0x329   :  { %v2004_v52 = vmul.f32 %v1956_v46, %v1908_v47  ;;  %v1909_v53 = vmax.f32 %v1847_v48, 0.0 }
 0x32a   :  { %v1626_v54 = vpop.f32.mrb[120].mxu1  ;;  %v1851_v55 = vpop.f32.mrb[120].mxu0  ;;  %p2490_p12 = pnand %p2489_p11, %p2483_p8 }
 0x32b   :  { %v2051_v56 = vadd.f32 %v2050_v41, %v2004_v52  ;;  %v2005_v57 = vmul.f32 %v1957_v49, %v1909_v53  ;;  %v1627_v58 = vadd.f32 %v1626_v54, %v919_v50  ;;  %v1628_v59 = vpop.f32.mrb[121].mxu1  ;;  %v1853_v60 = vpop.f32.mrb[121].mxu0 }
 0x32c   :  { %v1629_v61 = vpop.f32.mrb[122].mxu1  ;;  %v1854_v62 = vpop.f32.mrb[122].mxu0 }
 0x32d   :  { %v2052_v63 = vadd.f32 %v2051_v56, %v2005_v57  ;;  %v1852_v1 = vadd.f32 %v1851_v55, %v1627_v58  ;;  %v1630_v2 = vadd.f32 %v1629_v61, %v924_v51  ;;  %v1631_v3 = vpop.f32.mrb[123].mxu1  ;;  %v1856_v4 = vpop.f32.mrb[123].mxu0 }
 0x32f   :  { %v1910_v6 = vmax.f32 %v1852_v1, 0.0  ;;  %v1855_v7 = vadd.f32 %v1854_v62, %v1630_v2 }
 0x331   :  { %v2006_v11 = vmul.f32 %v1958_v5, %v1910_v6  ;;  %v1911_v12 = vmax.f32 %v1855_v7, 0.0 }
 0x332   :  { %v1634_v13 = vpop.f32.mrb[124].mxu1  ;;  %v1859_v14 = vpop.f32.mrb[124].mxu0 }
 0x333   :  { %v2053_v22 = vadd.f32 %v2052_v63, %v2006_v11  ;;  %v2007_v23 = vmul.f32 %v1959_v8, %v1911_v12  ;;  %v1635_v15 = vadd.f32 %v1634_v13, %v929_v9  ;;  %v1636_v16 = vpop.f32.mrb[125].mxu1  ;;  %v1861_v17 = vpop.f32.mrb[125].mxu0 }
 0x334   :  { %v1637_v24 = vpop.f32.mrb[126].mxu1  ;;  %v1862_v18 = vpop.f32.mrb[126].mxu0 }
 0x335   :  { %v2054_v25 = vadd.f32 %v2053_v22, %v2007_v23  ;;  %v1860_v19 = vadd.f32 %v1859_v14, %v1635_v15  ;;  %v1638_v20 = vadd.f32 %v1637_v24, %v934_v10  ;;  %v1639_v0 = vpop.f32.mrb[127].mxu1  ;;  %v1864_v21 = vpop.f32.mrb[127].mxu0 }
 0x337   :  { %v1912_v27 = vmax.f32 %v1860_v19, 0.0  ;;  %v1863_v28 = vadd.f32 %v1862_v18, %v1638_v20 }
 0x339   :  { %v2008_v30 = vmul.f32 %v1960_v26, %v1912_v27  ;;  %v1913_v31 = vmax.f32 %v1863_v28, 0.0 }
 0x33b   :  { %v2055_v32 = vadd.f32 %v2054_v25, %v2008_v30  ;;  %v2009_v33 = vmul.f32 %v1961_v29, %v1913_v31 }
 0x33d   :  { %v2056_v34 = vadd.f32 %v2055_v32, %v2009_v33 }
 0x33f   :  { %v2057_v35 = vrot.slane %v2056_v34, 4 }
 0x341   :  { %v2058_v36 = vadd.f32 %v2057_v35, %v2056_v34 }
 0x343   :  { %v2059_v37 = vrot.slane %v2058_v36, 2 }
 0x345   :  { %v2060_v38 = vadd.f32 %v2059_v37, %v2058_v36 }
 0x347   :  { %v2061_v39 = vrot.slane %v2060_v38, 1 }
 0x349   :  { %v2062_v41 = vadd.f32 %v2061_v39, %v2060_v38 }
 0x34b   :  { %v2064_v42 = vadd.f32 %v2063_v40, %v2062_v41 }
 0x34d   :  { %2065 = vst [vmem:[#allocation5] sm:$0x1] %v2064_v42 }
 0x34e   :  { %2493 = shalt.err (!%p2490_p12)
}
 0x34f   :  { %s2494_s28 = scalar_lea.hbm %s3125_s8, 16 }
 0x350   :  { %p2495_p13 = scmp.ne.s32.totalorder %s3125_s8, %s2494_s28  ;;  %p2498_p0 = scmp.lt.u32.totalorder %s2494_s28, %s3125_s8 }
 0x352   :  { %p2500_p1 = pnand %p2498_p0, %p2495_p13 }
 0x354   :  { %2503 = shalt.err (!%p2500_p1)
}
 0x355   :  { %2075 = dma.vmem_to_hbm [thread:$0]  %s2073_s24, 16, %s3125_s8, [#allocation4]  }
 0x356   :  { %2506 = dma.done.wait [#allocation4], 16  }
 0x357   :  { %2507 = vsyncadd [#allocation4], 4294967280 }
 0x358   :  { %2079 = vsyncpa [#allocation3], 1 }
 0x359   :  { %2080 = vsyncpa [#allocation4], 1 }

</bundles_post_ra>
